<compile_context>
chip_gen: v6e
topology: v6e:2x2x1
jax: 0.10.0
libtpu: 0.0.40
codegen_flags: <defaults>
</compile_context>

<pallas_src>
import functools
import math

import jax
import jax.numpy as jnp
from jax.experimental import pallas as pl
from jax.experimental.pallas import tpu as pltpu


# -----------------------------------------------------------------------------
# Tiling helper
# -----------------------------------------------------------------------------
def _pick_tile(dim: int, pref: int) -> int:
    """`pref` if it divides `dim`, otherwise the full dim (small-shape fallback)."""
    if dim <= pref:
        return dim
    if dim % pref == 0:
        return pref
    return dim


# Row-tile preference: 256 is 128-aligned (v5e MXU) and a half-footprint-friendly
# choice for v7x's 64 MiB VMEM; d_ff reduction tile preference 512.
_TM_PREF = 256
_TF_PREF = 512


# -----------------------------------------------------------------------------
# Kernel 1: (optional LayerNorm) + N linear projections, bf16 MXU, fp32 accum
# -----------------------------------------------------------------------------
def _make_ln_proj_kernel(n_proj: int, apply_ln: bool, eps: float):
    def kernel(*refs):
        idx = 0
        if apply_ln:
            ab_ref = refs[0]
            idx = 1
        x_ref = refs[idx]
        wb_refs = refs[idx + 1: idx + 1 + 2 * n_proj]
        out_refs = refs[idx + 1 + 2 * n_proj: idx + 1 + 3 * n_proj]

        x = x_ref[...].astype(jnp.float32)
        if apply_ln:
            d = x.shape[-1]
            mean = jnp.mean(x, axis=-1, keepdims=True)
            var = jnp.sum((x - mean) ** 2, axis=-1, keepdims=True) / (d - 1)
            x = ab_ref[0] * (x - mean) / (jnp.sqrt(var) + eps) + ab_ref[1]
        xb = x.astype(jnp.bfloat16)

        for j in range(n_proj):
            w = wb_refs[2 * j][...].astype(jnp.bfloat16)
            b = wb_refs[2 * j + 1][...]                       # fp32 [1, N]
            y = jnp.dot(xb, w, preferred_element_type=jnp.float32) + b
            out_refs[j][...] = y.astype(out_refs[j].dtype)

    return kernel


def ln_projections(x2d, ln_ab, weights_biases, *, apply_ln, eps=1e-6,
                   out_dtype=jnp.bfloat16):
    """x2d: [M, D] -> tuple of [M, N_j] projections (LayerNorm fused if apply_ln)."""
    M, D = x2d.shape
    tm = _pick_tile(M, _TM_PREF)
    n_proj = len(weights_biases)
    kernel = _make_ln_proj_kernel(n_proj, apply_ln, eps)

    in_specs = []
    args = []
    if apply_ln:
        in_specs.append(pl.BlockSpec(memory_space=pltpu.MemorySpace.SMEM))
        args.append(ln_ab)
    in_specs.append(pl.BlockSpec((tm, D), lambda i: (i, 0)))
    args.append(x2d)

    out_shapes, out_specs = [], []
    for (w, b) in weights_biases:
        N = w.shape[1]
        in_specs.append(pl.BlockSpec((D, N), lambda i: (0, 0)))   # weight stays resident
        in_specs.append(pl.BlockSpec((1, N), lambda i: (0, 0)))
        args += [w, b.reshape(1, N)]
        out_shapes.append(jax.ShapeDtypeStruct((M, N), out_dtype))
        out_specs.append(pl.BlockSpec((tm, N), lambda i: (i, 0)))

    outs = pl.pallas_call(
        kernel,
        out_shape=tuple(out_shapes),
        grid=(M // tm,),
        in_specs=in_specs,
        out_specs=tuple(out_specs),
        compiler_params=pltpu.CompilerParams(dimension_semantics=("parallel",)),
    )(*args)
    if not isinstance(outs, (tuple, list)):
        outs = (outs,)
    return tuple(outs)


# -----------------------------------------------------------------------------
# Kernel 2: flash-style attention (KV tiled reduction axis, heads sliced in-kernel)
# -----------------------------------------------------------------------------
def _attention_kernel(mask_ref, q_ref, k_ref, v_ref, o_ref,
                      m_sc, l_sc, acc_sc, *, num_heads, d_k):
    kv_idx = pl.program_id(2)
    scale = 1.0 / math.sqrt(d_k)

    @pl.when(kv_idx == 0)
    def _():
        m_sc[...] = jnp.full_like(m_sc, -jnp.inf)
        l_sc[...] = jnp.zeros_like(l_sc)
        acc_sc[...] = jnp.zeros_like(acc_sc)

    mask = mask_ref[0, 0]                         # [tq, tkv] int32
    q_all = q_ref[0]                              # [tq, D]  bf16
    k_all = k_ref[0]                              # [tkv, D] bf16
    v_all = v_ref[0]                              # [tkv, D] bf16

    for h in range(num_heads):                    # static unroll; static lane slices
        sl = slice(h * d_k, (h + 1) * d_k)
        q = q_all[:, sl].astype(jnp.bfloat16)
        k = k_all[:, sl].astype(jnp.bfloat16)
        v = v_all[:, sl].astype(jnp.bfloat16)

        s = jax.lax.dot_general(q, k, (((1,), (1,)), ((), ())),
                                preferred_element_type=jnp.float32) * scale
        s = jnp.where(mask == 0, jnp.float32(-1e9), s)

        m_prev = m_sc[h]                          # [tq, 1]
        l_prev = l_sc[h]
        m_new = jnp.maximum(m_prev, jnp.max(s, axis=-1, keepdims=True))
        alpha = jnp.exp(m_prev - m_new)
        p = jnp.exp(s - m_new)
        l_sc[h] = alpha * l_prev + jnp.sum(p, axis=-1, keepdims=True)
        pv = jnp.dot(p.astype(jnp.bfloat16), v, preferred_element_type=jnp.float32)
        acc_sc[h] = alpha * acc_sc[h] + pv
        m_sc[h] = m_new

    @pl.when(kv_idx == pl.num_programs(2) - 1)
    def _():
        pieces = []
        for h in range(num_heads):
            inv = pl.reciprocal(l_sc[h], approx=True)   # EUP slot, near-free
            pieces.append(acc_sc[h] * inv)
        o_ref[0] = jnp.concatenate(pieces, axis=-1).astype(o_ref.dtype)


def attention(q, k, v, mask, *, num_heads):
    """q: [B, Sq, D] bf16, k/v: [B, Skv, D] bf16, mask: [B, 1, Sq, Skv] int32."""
    B, Sq, D = q.shape
    Skv = k.shape[1]
    d_k = D // num_heads
    tq = _pick_tile(Sq, 128)
    tkv = _pick_tile(Skv, 128)

    return pl.pallas_call(
        functools.partial(_attention_kernel, num_heads=num_heads, d_k=d_k),
        out_shape=jax.ShapeDtypeStruct((B, Sq, D), jnp.bfloat16),
        grid=(B, Sq // tq, Skv // tkv),
        in_specs=[
            pl.BlockSpec((1, 1, tq, tkv), lambda b, qi, kv: (b, 0, qi, kv)),
            pl.BlockSpec((1, tq, D), lambda b, qi, kv: (b, qi, 0)),
            pl.BlockSpec((1, tkv, D), lambda b, qi, kv: (b, kv, 0)),
            pl.BlockSpec((1, tkv, D), lambda b, qi, kv: (b, kv, 0)),
        ],
        out_specs=pl.BlockSpec((1, tq, D), lambda b, qi, kv: (b, qi, 0)),
        scratch_shapes=[
            pltpu.VMEM((num_heads, tq, 1), jnp.float32),   # m (running max)
            pltpu.VMEM((num_heads, tq, 1), jnp.float32),   # l (running denom)
            pltpu.VMEM((num_heads, tq, d_k), jnp.float32), # acc
        ],
        compiler_params=pltpu.CompilerParams(
            dimension_semantics=("parallel", "parallel", "arbitrary")),
    )(mask, q, k, v)


# -----------------------------------------------------------------------------
# Kernel 3: output projection + residual add (fused)
# -----------------------------------------------------------------------------
def _oproj_res_kernel(x_ref, w_ref, b_ref, res_ref, o_ref):
    x = x_ref[...].astype(jnp.bfloat16)
    w = w_ref[...].astype(jnp.bfloat16)
    y = jnp.dot(x, w, preferred_element_type=jnp.float32) + b_ref[...]
    o_ref[...] = (y + res_ref[...].astype(jnp.float32)).astype(o_ref.dtype)


def oproj_residual(ctx2d, w, b, res2d):
    M, D = res2d.shape
    tm = _pick_tile(M, _TM_PREF)
    return pl.pallas_call(
        _oproj_res_kernel,
        out_shape=jax.ShapeDtypeStruct((M, D), res2d.dtype),
        grid=(M // tm,),
        in_specs=[
            pl.BlockSpec((tm, D), lambda i: (i, 0)),
            pl.BlockSpec((D, D), lambda i: (0, 0)),
            pl.BlockSpec((1, D), lambda i: (0, 0)),
            pl.BlockSpec((tm, D), lambda i: (i, 0)),
        ],
        out_specs=pl.BlockSpec((tm, D), lambda i: (i, 0)),
        compiler_params=pltpu.CompilerParams(dimension_semantics=("parallel",)),
    )(ctx2d, w, b.reshape(1, D), res2d)


# -----------------------------------------------------------------------------
# Kernel 4: LayerNorm + FFN (d_ff-tiled reduction) + residual (fused)
# -----------------------------------------------------------------------------
def _ln_ffn_res_kernel(ab_ref, x_ref, w1_ref, b1_ref, w2_ref, b2_ref, res_ref,
                       o_ref, acc_ref, *, eps):
    f = pl.program_id(1)

    @pl.when(f == 0)
    def _():
        acc_ref[...] = jnp.zeros_like(acc_ref)

    x = x_ref[...].astype(jnp.float32)
    d = x.shape[-1]
    mean = jnp.mean(x, axis=-1, keepdims=True)
    var = jnp.sum((x - mean) ** 2, axis=-1, keepdims=True) / (d - 1)
    xn = (ab_ref[0] * (x - mean) / (jnp.sqrt(var) + eps) + ab_ref[1]).astype(jnp.bfloat16)

    h = jnp.dot(xn, w1_ref[...].astype(jnp.bfloat16),
                preferred_element_type=jnp.float32) + b1_ref[...]
    h = jnp.maximum(h, 0.0).astype(jnp.bfloat16)          # bf16 intermediate
    acc_ref[...] += jnp.dot(h, w2_ref[...].astype(jnp.bfloat16),
                            preferred_element_type=jnp.float32)

    @pl.when(f == pl.num_programs(1) - 1)
    def _():
        out = acc_ref[...] + b2_ref[...] + res_ref[...].astype(jnp.float32)
        o_ref[...] = out.astype(o_ref.dtype)


def ln_ffn_residual(x2d, ln_ab, w1, b1, w2, b2, res2d, *, eps=1e-6):
    M, D = x2d.shape
    d_ff = w1.shape[1]
    tm = _pick_tile(M, _TM_PREF)
    tf = _pick_tile(d_ff, _TF_PREF)
    return pl.pallas_call(
        functools.partial(_ln_ffn_res_kernel, eps=eps),
        out_shape=jax.ShapeDtypeStruct((M, D), x2d.dtype),
        grid=(M // tm, d_ff // tf),
        in_specs=[
            pl.BlockSpec(memory_space=pltpu.MemorySpace.SMEM),
            pl.BlockSpec((tm, D), lambda i, f: (i, 0)),
            pl.BlockSpec((D, tf), lambda i, f: (0, f)),
            pl.BlockSpec((1, tf), lambda i, f: (0, f)),
            pl.BlockSpec((tf, D), lambda i, f: (f, 0)),
            pl.BlockSpec((1, D), lambda i, f: (0, 0)),
            pl.BlockSpec((tm, D), lambda i, f: (i, 0)),
        ],
        out_specs=pl.BlockSpec((tm, D), lambda i, f: (i, 0)),
        scratch_shapes=[pltpu.VMEM((tm, D), jnp.float32)],
        compiler_params=pltpu.CompilerParams(
            dimension_semantics=("parallel", "arbitrary")),
    )(ln_ab, x2d, w1, b1.reshape(1, d_ff), w2, b2.reshape(1, D), res2d)


# -----------------------------------------------------------------------------
# DecoderBlock forward (ResidualConnection: x + sublayer(norm(x)), dropout = id)
# -----------------------------------------------------------------------------
def _self_attention_sublayer(x, mask, p, ln_ab, h):
    B, S, D = x.shape
    x2d = x.reshape(B * S, D)
    q, k, v = ln_projections(
        x2d, ln_ab,
        [(p["wq"], p["bq"]), (p["wk"], p["bk"]), (p["wv"], p["bv"])],
        apply_ln=True)
    ctx = attention(q.reshape(B, S, D), k.reshape(B, S, D), v.reshape(B, S, D),
                    mask, num_heads=h)
    out = oproj_residual(ctx.reshape(B * S, D), p["wo"], p["bo"], x2d)
    return out.reshape(B, S, D)


def _cross_attention_sublayer(x, enc, mask, p, ln_ab, h):
    B, Sq, D = x.shape
    Skv = enc.shape[1]
    x2d = x.reshape(B * Sq, D)
    (q,) = ln_projections(x2d, ln_ab, [(p["wq"], p["bq"])], apply_ln=True)
    k, v = ln_projections(enc.reshape(B * Skv, D), None,
                          [(p["wk"], p["bk"]), (p["wv"], p["bv"])],
                          apply_ln=False)
    ctx = attention(q.reshape(B, Sq, D), k.reshape(B, Skv, D), v.reshape(B, Skv, D),
                    mask, num_heads=h)
    out = oproj_residual(ctx.reshape(B * Sq, D), p["wo"], p["bo"], x2d)
    return out.reshape(B, Sq, D)


def decoder_block(x, encoder_output, src_mask, tgt_mask, params, h):
    x = _self_attention_sublayer(x, tgt_mask, params["self_attn"], params["ln0"], h)
    x = _cross_attention_sublayer(x, encoder_output, src_mask,
                                  params["cross_attn"], params["ln1"], h)
    B, S, D = x.shape
    f = params["ffn"]
    out = ln_ffn_residual(x.reshape(B * S, D), params["ln2"],
                          f["w1"], f["b1"], f["w2"], f["b2"], x.reshape(B * S, D))
    return out.reshape(B, S, D)


# -----------------------------------------------------------------------------
# Deterministic parameter init (weights stored bf16 for the MXU, biases fp32)
# -----------------------------------------------------------------------------
def _init_linear(key, d_in, d_out):
    kw, kb = jax.random.split(key)
    w = (jax.random.normal(kw, (d_in, d_out), jnp.float32) * 0.05).astype(jnp.bfloat16)
    b = jax.random.normal(kb, (d_out,), jnp.float32) * 0.01
    return w, b


def init_params(key, d_model, d_ff):
    keys = jax.random.split(key, 10)

    def attn_params(ks):
        wq, bq = _init_linear(ks[0], d_model, d_model)
        wk, bk = _init_linear(ks[1], d_model, d_model)
        wv, bv = _init_linear(ks[2], d_model, d_model)
        wo, bo = _init_linear(ks[3], d_model, d_model)
        return dict(wq=wq, bq=bq, wk=wk, bk=bk, wv=wv, bv=bv, wo=wo, bo=bo)

    w1, b1 = _init_linear(keys[8], d_model, d_ff)
    w2, b2 = _init_linear(keys[9], d_ff, d_model)
    ln = lambda: jnp.array([1.0, 0.0], jnp.float32)   # [alpha, bias] (torch.ones/zeros(1))
    return {
        "self_attn": attn_params(keys[0:4]),
        "cross_attn": attn_params(keys[4:8]),
        "ffn": dict(w1=w1, b1=b1, w2=w2, b2=b2),
        "ln0": ln(), "ln1": ln(), "ln2": ln(),
    }


# -----------------------------------------------------------------------------
if __name__ == "__main__":
    B, S, D, H, D_FF = 2, 8, 32, 4, 64

    root = jax.random.PRNGKey(0)
    k_x, k_enc, k_p = jax.random.split(root, 3)

    x = jax.random.normal(k_x, (B, S, D), jnp.float32)
    encoder_output = jax.random.normal(k_enc, (B, S, D), jnp.float32)

    # src_mask: all-ones; tgt_mask: causal lower-triangular; shape [B, 1, S, S]
    src_mask = jnp.ones((B, 1, S, S), jnp.int32)
    tgt_mask = (jnp.tril(jnp.ones((S, S), jnp.int32))[None, None]
                * jnp.ones((B, 1, 1, 1), jnp.int32))

    params = init_params(k_p, D, D_FF)

    fwd = jax.jit(functools.partial(decoder_block, h=H))
    out = fwd(x, encoder_output, src_mask, tgt_mask, params)
    jax.block_until_ready(out)

    assert out.shape == (B, S, D) and out.dtype == jnp.float32
    print("KERNEL_OK")
</pallas_src>

<mosaic_0001>
module attributes {stable_mosaic.version = 11 : i64} {
  func.func @kernel(%arg0: i32, %arg1: memref<16x32xf32, #tpu.memory_space<vmem>>, %arg2: memref<32x32xbf16, #tpu.memory_space<vmem>>, %arg3: memref<1x32xf32, #tpu.memory_space<vmem>>, %arg4: memref<32x32xbf16, #tpu.memory_space<vmem>>, %arg5: memref<1x32xf32, #tpu.memory_space<vmem>>, %arg6: memref<16x32xbf16, #tpu.memory_space<vmem>>, %arg7: memref<16x32xbf16, #tpu.memory_space<vmem>>) attributes {dimension_semantics = [#tpu.dimension_semantics<parallel>], iteration_bounds = array<i64: 1>, scalar_prefetch = 0 : i64, scratch_operands = 0 : i64, tpu.core_type = #tpu.core_type<tc>, window_params = [{transform_indices = @transform_0, window_bounds = array<i64: 16, 32>}, {pipeline_mode = #tpu.pipeline_mode<synchronous>, transform_indices = @transform_1, window_bounds = array<i64: 32, 32>}, {pipeline_mode = #tpu.pipeline_mode<synchronous>, transform_indices = @transform_2, window_bounds = array<i64: 1, 32>}, {pipeline_mode = #tpu.pipeline_mode<synchronous>, transform_indices = @transform_3, window_bounds = array<i64: 32, 32>}, {pipeline_mode = #tpu.pipeline_mode<synchronous>, transform_indices = @transform_4, window_bounds = array<i64: 1, 32>}, {transform_indices = @transform_5, window_bounds = array<i64: 16, 32>}, {transform_indices = @transform_6, window_bounds = array<i64: 16, 32>}]} {
    %c0 = arith.constant 0 : index
    %c0_0 = arith.constant 0 : index
    %0 = vector.load %arg1[%c0, %c0_0] : memref<16x32xf32, #tpu.memory_space<vmem>>, vector<16x32xf32>
    %1 = arith.truncf %0 : vector<16x32xf32> to vector<16x32xbf16>
    %c0_1 = arith.constant 0 : index
    %c0_2 = arith.constant 0 : index
    %2 = vector.load %arg2[%c0_1, %c0_2] : memref<32x32xbf16, #tpu.memory_space<vmem>>, vector<32x32xbf16>
    %c0_3 = arith.constant 0 : index
    %c0_4 = arith.constant 0 : index
    %3 = vector.load %arg3[%c0_3, %c0_4] : memref<1x32xf32, #tpu.memory_space<vmem>>, vector<1x32xf32>
    %cst = arith.constant dense<0.000000e+00> : vector<16x32xf32>
    %4 = tpu.matmul %1, %2, %cst {dimension_numbers = #tpu.dot_dimension_numbers<[1], [0], [0], [1], [0, 0, 1, 1], [], []>} : vector<16x32xbf16>, vector<32x32xbf16>, vector<16x32xf32> -> vector<16x32xf32>
    %5 = vector.broadcast %3 : vector<1x32xf32> to vector<16x32xf32>
    %6 = arith.addf %4, %5 : vector<16x32xf32>
    %7 = arith.truncf %6 : vector<16x32xf32> to vector<16x32xbf16>
    %c0_5 = arith.constant 0 : index
    %c0_6 = arith.constant 0 : index
    %8 = vector.load %arg6[%c0_5, %c0_6] : memref<16x32xbf16, #tpu.memory_space<vmem>>, vector<16x32xbf16>
    tpu.vector_store %arg6[%c0_5, %c0_6], %7 {strides = array<i32>} : memref<16x32xbf16, #tpu.memory_space<vmem>>, vector<16x32xbf16>,
    %c0_7 = arith.constant 0 : index
    %c0_8 = arith.constant 0 : index
    %9 = vector.load %arg4[%c0_7, %c0_8] : memref<32x32xbf16, #tpu.memory_space<vmem>>, vector<32x32xbf16>
    %c0_9 = arith.constant 0 : index
    %c0_10 = arith.constant 0 : index
    %10 = vector.load %arg5[%c0_9, %c0_10] : memref<1x32xf32, #tpu.memory_space<vmem>>, vector<1x32xf32>
    %cst_11 = arith.constant dense<0.000000e+00> : vector<16x32xf32>
    %11 = tpu.matmul %1, %9, %cst_11 {dimension_numbers = #tpu.dot_dimension_numbers<[1], [0], [0], [1], [0, 0, 1, 1], [], []>} : vector<16x32xbf16>, vector<32x32xbf16>, vector<16x32xf32> -> vector<16x32xf32>
    %12 = vector.broadcast %10 : vector<1x32xf32> to vector<16x32xf32>
    %13 = arith.addf %11, %12 : vector<16x32xf32>
    %14 = arith.truncf %13 : vector<16x32xf32> to vector<16x32xbf16>
    %c0_12 = arith.constant 0 : index
    %c0_13 = arith.constant 0 : index
    %15 = vector.load %arg7[%c0_12, %c0_13] : memref<16x32xbf16, #tpu.memory_space<vmem>>, vector<16x32xbf16>
    tpu.vector_store %arg7[%c0_12, %c0_13], %14 {strides = array<i32>} : memref<16x32xbf16, #tpu.memory_space<vmem>>, vector<16x32xbf16>,
    return
  }
  func.func @transform_0(%arg0: i32) -> (i32, i32) {
    %c0_i32 = arith.constant 0 : i32
    %c0_i32_0 = arith.constant 0 : i32
    return %arg0, %c0_i32 : i32, i32
  }
  func.func @transform_1(%arg0: i32) -> (i32, i32) {
    %c0_i32 = arith.constant 0 : i32
    %c0_i32_0 = arith.constant 0 : i32
    %c0_i32_1 = arith.constant 0 : i32
    return %c0_i32, %c0_i32_0 : i32, i32
  }
  func.func @transform_2(%arg0: i32) -> (i32, i32) {
    %c0_i32 = arith.constant 0 : i32
    %c0_i32_0 = arith.constant 0 : i32
    %c0_i32_1 = arith.constant 0 : i32
    return %c0_i32, %c0_i32_0 : i32, i32
  }
  func.func @transform_3(%arg0: i32) -> (i32, i32) {
    %c0_i32 = arith.constant 0 : i32
    %c0_i32_0 = arith.constant 0 : i32
    %c0_i32_1 = arith.constant 0 : i32
    return %c0_i32, %c0_i32_0 : i32, i32
  }
  func.func @transform_4(%arg0: i32) -> (i32, i32) {
    %c0_i32 = arith.constant 0 : i32
    %c0_i32_0 = arith.constant 0 : i32
    %c0_i32_1 = arith.constant 0 : i32
    return %c0_i32, %c0_i32_0 : i32, i32
  }
  func.func @transform_5(%arg0: i32) -> (i32, i32) {
    %c0_i32 = arith.constant 0 : i32
    %c0_i32_0 = arith.constant 0 : i32
    return %arg0, %c0_i32 : i32, i32
  }
  func.func @transform_6(%arg0: i32) -> (i32, i32) {
    %c0_i32 = arith.constant 0 : i32
    %c0_i32_0 = arith.constant 0 : i32
    return %arg0, %c0_i32 : i32, i32
  }
}

module attributes {stable_mosaic.version = 11 : i64} {
  func.func @kernel(%arg0: i32, %arg1: memref<2xf32, #tpu.memory_space<smem>>, %arg2: memref<16x32xf32, #tpu.memory_space<vmem>>, %arg3: memref<32x32xbf16, #tpu.memory_space<vmem>>, %arg4: memref<1x32xf32, #tpu.memory_space<vmem>>, %arg5: memref<32x32xbf16, #tpu.memory_space<vmem>>, %arg6: memref<1x32xf32, #tpu.memory_space<vmem>>, %arg7: memref<32x32xbf16, #tpu.memory_space<vmem>>, %arg8: memref<1x32xf32, #tpu.memory_space<vmem>>, %arg9: memref<16x32xbf16, #tpu.memory_space<vmem>>, %arg10: memref<16x32xbf16, #tpu.memory_space<vmem>>, %arg11: memref<16x32xbf16, #tpu.memory_space<vmem>>) attributes {dimension_semantics = [#tpu.dimension_semantics<parallel>], iteration_bounds = array<i64: 1>, scalar_prefetch = 0 : i64, scratch_operands = 0 : i64, tpu.core_type = #tpu.core_type<tc>, window_params = [{transform_indices = @transform_0, window_bounds = array<i64: 2>}, {transform_indices = @transform_1, window_bounds = array<i64: 16, 32>}, {pipeline_mode = #tpu.pipeline_mode<synchronous>, transform_indices = @transform_2, window_bounds = array<i64: 32, 32>}, {pipeline_mode = #tpu.pipeline_mode<synchronous>, transform_indices = @transform_3, window_bounds = array<i64: 1, 32>}, {pipeline_mode = #tpu.pipeline_mode<synchronous>, transform_indices = @transform_4, window_bounds = array<i64: 32, 32>}, {pipeline_mode = #tpu.pipeline_mode<synchronous>, transform_indices = @transform_5, window_bounds = array<i64: 1, 32>}, {pipeline_mode = #tpu.pipeline_mode<synchronous>, transform_indices = @transform_6, window_bounds = array<i64: 32, 32>}, {pipeline_mode = #tpu.pipeline_mode<synchronous>, transform_indices = @transform_7, window_bounds = array<i64: 1, 32>}, {transform_indices = @transform_8, window_bounds = array<i64: 16, 32>}, {transform_indices = @transform_9, window_bounds = array<i64: 16, 32>}, {transform_indices = @transform_10, window_bounds = array<i64: 16, 32>}]} {
    %c0 = arith.constant 0 : index
    %c0_0 = arith.constant 0 : index
    %0 = vector.load %arg2[%c0, %c0_0] : memref<16x32xf32, #tpu.memory_space<vmem>>, vector<16x32xf32>
    %cst = arith.constant dense<0.000000e+00> : vector<16xf32>
    %1 = vector.multi_reduction <add>, %0, %cst [1] : vector<16x32xf32> to vector<16xf32>
    %2 = vector.shape_cast %1 : vector<16xf32> to vector<16x1xf32>
    %cst_1 = arith.constant 3.200000e+01 : f32
    %3 = vector.broadcast %cst_1 : f32 to vector<16x1xf32>
    %4 = arith.divf %2, %3 : vector<16x1xf32>
    %5 = vector.broadcast %4 : vector<16x1xf32> to vector<16x32xf32>
    %6 = arith.subf %0, %5 : vector<16x32xf32>
    %7 = arith.mulf %6, %6 : vector<16x32xf32>
    %cst_2 = arith.constant dense<0.000000e+00> : vector<16xf32>
    %8 = vector.multi_reduction <add>, %7, %cst_2 [1] : vector<16x32xf32> to vector<16xf32>
    %9 = vector.shape_cast %8 : vector<16xf32> to vector<16x1xf32>
    %cst_3 = arith.constant 3.100000e+01 : f32
    %10 = vector.broadcast %cst_3 : f32 to vector<16x1xf32>
    %11 = arith.divf %9, %10 : vector<16x1xf32>
    %c0_4 = arith.constant 0 : index
    %12 = memref.load %arg1[%c0_4] : memref<2xf32, #tpu.memory_space<smem>>
    %13 = vector.broadcast %4 : vector<16x1xf32> to vector<16x32xf32>
    %14 = arith.subf %0, %13 : vector<16x32xf32>
    %15 = vector.broadcast %12 : f32 to vector<16x32xf32>
    %16 = arith.mulf %15, %14 : vector<16x32xf32>
    %17 = math.sqrt %11 : vector<16x1xf32>
    %cst_5 = arith.constant 9.99999997E-7 : f32
    %18 = vector.broadcast %cst_5 : f32 to vector<16x1xf32>
    %19 = arith.addf %17, %18 : vector<16x1xf32>
    %20 = vector.broadcast %19 : vector<16x1xf32> to vector<16x32xf32>
    %21 = arith.divf %16, %20 : vector<16x32xf32>
    %c1 = arith.constant 1 : index
    %22 = memref.load %arg1[%c1] : memref<2xf32, #tpu.memory_space<smem>>
    %23 = vector.broadcast %22 : f32 to vector<16x32xf32>
    %24 = arith.addf %21, %23 : vector<16x32xf32>
    %25 = arith.truncf %24 : vector<16x32xf32> to vector<16x32xbf16>
    %c0_6 = arith.constant 0 : index
    %c0_7 = arith.constant 0 : index
    %26 = vector.load %arg3[%c0_6, %c0_7] : memref<32x32xbf16, #tpu.memory_space<vmem>>, vector<32x32xbf16>
    %c0_8 = arith.constant 0 : index
    %c0_9 = arith.constant 0 : index
    %27 = vector.load %arg4[%c0_8, %c0_9] : memref<1x32xf32, #tpu.memory_space<vmem>>, vector<1x32xf32>
    %cst_10 = arith.constant dense<0.000000e+00> : vector<16x32xf32>
    %28 = tpu.matmul %25, %26, %cst_10 {dimension_numbers = #tpu.dot_dimension_numbers<[1], [0], [0], [1], [0, 0, 1, 1], [], []>} : vector<16x32xbf16>, vector<32x32xbf16>, vector<16x32xf32> -> vector<16x32xf32>
    %29 = vector.broadcast %27 : vector<1x32xf32> to vector<16x32xf32>
    %30 = arith.addf %28, %29 : vector<16x32xf32>
    %31 = arith.truncf %30 : vector<16x32xf32> to vector<16x32xbf16>
    %c0_11 = arith.constant 0 : index
    %c0_12 = arith.constant 0 : index
    %32 = vector.load %arg9[%c0_11, %c0_12] : memref<16x32xbf16, #tpu.memory_space<vmem>>, vector<16x32xbf16>
    tpu.vector_store %arg9[%c0_11, %c0_12], %31 {strides = array<i32>} : memref<16x32xbf16, #tpu.memory_space<vmem>>, vector<16x32xbf16>,
    %c0_13 = arith.constant 0 : index
    %c0_14 = arith.constant 0 : index
    %33 = vector.load %arg5[%c0_13, %c0_14] : memref<32x32xbf16, #tpu.memory_space<vmem>>, vector<32x32xbf16>
    %c0_15 = arith.constant 0 : index
    %c0_16 = arith.constant 0 : index
    %34 = vector.load %arg6[%c0_15, %c0_16] : memref<1x32xf32, #tpu.memory_space<vmem>>, vector<1x32xf32>
    %cst_17 = arith.constant dense<0.000000e+00> : vector<16x32xf32>
    %35 = tpu.matmul %25, %33, %cst_17 {dimension_numbers = #tpu.dot_dimension_numbers<[1], [0], [0], [1], [0, 0, 1, 1], [], []>} : vector<16x32xbf16>, vector<32x32xbf16>, vector<16x32xf32> -> vector<16x32xf32>
    %36 = vector.broadcast %34 : vector<1x32xf32> to vector<16x32xf32>
    %37 = arith.addf %35, %36 : vector<16x32xf32>
    %38 = arith.truncf %37 : vector<16x32xf32> to vector<16x32xbf16>
    %c0_18 = arith.constant 0 : index
    %c0_19 = arith.constant 0 : index
    %39 = vector.load %arg10[%c0_18, %c0_19] : memref<16x32xbf16, #tpu.memory_space<vmem>>, vector<16x32xbf16>
    tpu.vector_store %arg10[%c0_18, %c0_19], %38 {strides = array<i32>} : memref<16x32xbf16, #tpu.memory_space<vmem>>, vector<16x32xbf16>,
    %c0_20 = arith.constant 0 : index
    %c0_21 = arith.constant 0 : index
    %40 = vector.load %arg7[%c0_20, %c0_21] : memref<32x32xbf16, #tpu.memory_space<vmem>>, vector<32x32xbf16>
    %c0_22 = arith.constant 0 : index
    %c0_23 = arith.constant 0 : index
    %41 = vector.load %arg8[%c0_22, %c0_23] : memref<1x32xf32, #tpu.memory_space<vmem>>, vector<1x32xf32>
    %cst_24 = arith.constant dense<0.000000e+00> : vector<16x32xf32>
    %42 = tpu.matmul %25, %40, %cst_24 {dimension_numbers = #tpu.dot_dimension_numbers<[1], [0], [0], [1], [0, 0, 1, 1], [], []>} : vector<16x32xbf16>, vector<32x32xbf16>, vector<16x32xf32> -> vector<16x32xf32>
    %43 = vector.broadcast %41 : vector<1x32xf32> to vector<16x32xf32>
    %44 = arith.addf %42, %43 : vector<16x32xf32>
    %45 = arith.truncf %44 : vector<16x32xf32> to vector<16x32xbf16>
    %c0_25 = arith.constant 0 : index
    %c0_26 = arith.constant 0 : index
    %46 = vector.load %arg11[%c0_25, %c0_26] : memref<16x32xbf16, #tpu.memory_space<vmem>>, vector<16x32xbf16>
    tpu.vector_store %arg11[%c0_25, %c0_26], %45 {strides = array<i32>} : memref<16x32xbf16, #tpu.memory_space<vmem>>, vector<16x32xbf16>,
    return
  }
  func.func @transform_0(%arg0: i32) -> i32 {
    %c0_i32 = arith.constant 0 : i32
    %c0_i32_0 = arith.constant 0 : i32
    return %c0_i32 : i32
  }
  func.func @transform_1(%arg0: i32) -> (i32, i32) {
    %c0_i32 = arith.constant 0 : i32
    %c0_i32_0 = arith.constant 0 : i32
    return %arg0, %c0_i32 : i32, i32
  }
  func.func @transform_2(%arg0: i32) -> (i32, i32) {
    %c0_i32 = arith.constant 0 : i32
    %c0_i32_0 = arith.constant 0 : i32
    %c0_i32_1 = arith.constant 0 : i32
    return %c0_i32, %c0_i32_0 : i32, i32
  }
  func.func @transform_3(%arg0: i32) -> (i32, i32) {
    %c0_i32 = arith.constant 0 : i32
    %c0_i32_0 = arith.constant 0 : i32
    %c0_i32_1 = arith.constant 0 : i32
    return %c0_i32, %c0_i32_0 : i32, i32
  }
  func.func @transform_4(%arg0: i32) -> (i32, i32) {
    %c0_i32 = arith.constant 0 : i32
    %c0_i32_0 = arith.constant 0 : i32
    %c0_i32_1 = arith.constant 0 : i32
    return %c0_i32, %c0_i32_0 : i32, i32
  }
  func.func @transform_5(%arg0: i32) -> (i32, i32) {
    %c0_i32 = arith.constant 0 : i32
    %c0_i32_0 = arith.constant 0 : i32
    %c0_i32_1 = arith.constant 0 : i32
    return %c0_i32, %c0_i32_0 : i32, i32
  }
  func.func @transform_6(%arg0: i32) -> (i32, i32) {
    %c0_i32 = arith.constant 0 : i32
    %c0_i32_0 = arith.constant 0 : i32
    %c0_i32_1 = arith.constant 0 : i32
    return %c0_i32, %c0_i32_0 : i32, i32
  }
  func.func @transform_7(%arg0: i32) -> (i32, i32) {
    %c0_i32 = arith.constant 0 : i32
    %c0_i32_0 = arith.constant 0 : i32
    %c0_i32_1 = arith.constant 0 : i32
    return %c0_i32, %c0_i32_0 : i32, i32
  }
  func.func @transform_8(%arg0: i32) -> (i32, i32) {
    %c0_i32 = arith.constant 0 : i32
    %c0_i32_0 = arith.constant 0 : i32
    return %arg0, %c0_i32 : i32, i32
  }
  func.func @transform_9(%arg0: i32) -> (i32, i32) {
    %c0_i32 = arith.constant 0 : i32
    %c0_i32_0 = arith.constant 0 : i32
    return %arg0, %c0_i32 : i32, i32
  }
  func.func @transform_10(%arg0: i32) -> (i32, i32) {
    %c0_i32 = arith.constant 0 : i32
    %c0_i32_0 = arith.constant 0 : i32
    return %arg0, %c0_i32 : i32, i32
  }
}

module attributes {stable_mosaic.version = 11 : i64} {
  func.func @_attention_kernel(%arg0: i32, %arg1: i32, %arg2: i32, %arg3: memref<1x1x8x8xi32, #tpu.memory_space<vmem>>, %arg4: memref<1x8x32xbf16, #tpu.memory_space<vmem>>, %arg5: memref<1x8x32xbf16, #tpu.memory_space<vmem>>, %arg6: memref<1x8x32xbf16, #tpu.memory_space<vmem>>, %arg7: memref<1x8x32xbf16, #tpu.memory_space<vmem>>, %arg8: memref<4x8x1xf32, #tpu.memory_space<vmem>>, %arg9: memref<4x8x1xf32, #tpu.memory_space<vmem>>, %arg10: memref<4x8x8xf32, #tpu.memory_space<vmem>>) attributes {dimension_semantics = [#tpu.dimension_semantics<parallel>, #tpu.dimension_semantics<parallel>, #tpu.dimension_semantics<arbitrary>], iteration_bounds = array<i64: 2, 1, 1>, scalar_prefetch = 0 : i64, scratch_operands = 3 : i64, tpu.core_type = #tpu.core_type<tc>, window_params = [{transform_indices = @transform_0, window_bounds = array<i64: 1, 1, 8, 8>}, {transform_indices = @transform_1, window_bounds = array<i64: 1, 8, 32>}, {transform_indices = @transform_2, window_bounds = array<i64: 1, 8, 32>}, {transform_indices = @transform_3, window_bounds = array<i64: 1, 8, 32>}, {transform_indices = @transform_4, window_bounds = array<i64: 1, 8, 32>}]} {
    %c0_i32 = arith.constant 0 : i32
    %0 = arith.cmpi eq, %arg2, %c0_i32 : i32
    %1 = arith.extui %0 : i1 to i32
    %c0_i32_0 = arith.constant 0 : i32
    %2 = arith.cmpi ne, %1, %c0_i32_0 : i32
    scf.if %2 {
      %cst_111 = arith.constant 0xFF800000 : f32
      %182 = vector.broadcast %cst_111 : f32 to vector<4x8x1xf32>
      %c0_112 = arith.constant 0 : index
      %c0_113 = arith.constant 0 : index
      %c0_114 = arith.constant 0 : index
      %183 = vector.load %arg8[%c0_112, %c0_113, %c0_114] : memref<4x8x1xf32, #tpu.memory_space<vmem>>, vector<4x8x1xf32>
      tpu.vector_store %arg8[%c0_112, %c0_113, %c0_114], %182 {strides = array<i32>} : memref<4x8x1xf32, #tpu.memory_space<vmem>>, vector<4x8x1xf32>,
      %cst_115 = arith.constant 0.000000e+00 : f32
      %184 = vector.broadcast %cst_115 : f32 to vector<4x8x1xf32>
      %c0_116 = arith.constant 0 : index
      %c0_117 = arith.constant 0 : index
      %c0_118 = arith.constant 0 : index
      %185 = vector.load %arg9[%c0_116, %c0_117, %c0_118] : memref<4x8x1xf32, #tpu.memory_space<vmem>>, vector<4x8x1xf32>
      tpu.vector_store %arg9[%c0_116, %c0_117, %c0_118], %184 {strides = array<i32>} : memref<4x8x1xf32, #tpu.memory_space<vmem>>, vector<4x8x1xf32>,
      %cst_119 = arith.constant 0.000000e+00 : f32
      %186 = vector.broadcast %cst_119 : f32 to vector<4x8x8xf32>
      %c0_120 = arith.constant 0 : index
      %c0_121 = arith.constant 0 : index
      %c0_122 = arith.constant 0 : index
      %187 = vector.load %arg10[%c0_120, %c0_121, %c0_122] : memref<4x8x8xf32, #tpu.memory_space<vmem>>, vector<4x8x8xf32>
      tpu.vector_store %arg10[%c0_120, %c0_121, %c0_122], %186 {strides = array<i32>} : memref<4x8x8xf32, #tpu.memory_space<vmem>>, vector<4x8x8xf32>,
    } else {
    }
    %c0 = arith.constant 0 : index
    %c0_1 = arith.constant 0 : index
    %c0_2 = arith.constant 0 : index
    %c0_3 = arith.constant 0 : index
    %3 = vector.load %arg3[%c0, %c0_1, %c0_2, %c0_3] : memref<1x1x8x8xi32, #tpu.memory_space<vmem>>, vector<1x1x8x8xi32>
    %4 = vector.shape_cast %3 : vector<1x1x8x8xi32> to vector<8x8xi32>
    %c0_4 = arith.constant 0 : index
    %c0_5 = arith.constant 0 : index
    %c0_6 = arith.constant 0 : index
    %5 = vector.load %arg4[%c0_4, %c0_5, %c0_6] : memref<1x8x32xbf16, #tpu.memory_space<vmem>>, vector<1x8x32xbf16>
    %6 = vector.shape_cast %5 : vector<1x8x32xbf16> to vector<8x32xbf16>
    %c0_7 = arith.constant 0 : index
    %c0_8 = arith.constant 0 : index
    %c0_9 = arith.constant 0 : index
    %7 = vector.load %arg5[%c0_7, %c0_8, %c0_9] : memref<1x8x32xbf16, #tpu.memory_space<vmem>>, vector<1x8x32xbf16>
    %8 = vector.shape_cast %7 : vector<1x8x32xbf16> to vector<8x32xbf16>
    %c0_10 = arith.constant 0 : index
    %c0_11 = arith.constant 0 : index
    %c0_12 = arith.constant 0 : index
    %9 = vector.load %arg6[%c0_10, %c0_11, %c0_12] : memref<1x8x32xbf16, #tpu.memory_space<vmem>>, vector<1x8x32xbf16>
    %10 = vector.shape_cast %9 : vector<1x8x32xbf16> to vector<8x32xbf16>
    %11 = vector.extract_strided_slice %6 {offsets = [0, 0], sizes = [8, 8], strides = [1, 1]} : vector<8x32xbf16> to vector<8x8xbf16>
    %12 = vector.extract_strided_slice %8 {offsets = [0, 0], sizes = [8, 8], strides = [1, 1]} : vector<8x32xbf16> to vector<8x8xbf16>
    %13 = vector.extract_strided_slice %10 {offsets = [0, 0], sizes = [8, 8], strides = [1, 1]} : vector<8x32xbf16> to vector<8x8xbf16>
    %cst = arith.constant dense<0.000000e+00> : vector<8x8xf32>
    %14 = tpu.matmul %11, %12, %cst {dimension_numbers = #tpu.dot_dimension_numbers<[1], [1], [0], [0], [0, 0, 1, 0], [], []>} : vector<8x8xbf16>, vector<8x8xbf16>, vector<8x8xf32> -> vector<8x8xf32>
    %cst_13 = arith.constant 0.353553385 : f32
    %15 = vector.broadcast %cst_13 : f32 to vector<8x8xf32>
    %16 = arith.mulf %14, %15 : vector<8x8xf32>
    %c0_i32_14 = arith.constant 0 : i32
    %17 = vector.broadcast %c0_i32_14 : i32 to vector<8x8xi32>
    %18 = arith.cmpi eq, %4, %17 : vector<8x8xi32>
    %cst_15 = arith.constant -1.000000e+09 : f32
    %19 = vector.broadcast %cst_15 : f32 to vector<8x8xf32>
    %20 = arith.select %18, %19, %16 : vector<8x8xi1>, vector<8x8xf32>
    %c0_16 = arith.constant 0 : index
    %c0_17 = arith.constant 0 : index
    %c0_18 = arith.constant 0 : index
    %21 = vector.load %arg8[%c0_16, %c0_17, %c0_18] : memref<4x8x1xf32, #tpu.memory_space<vmem>>, vector<1x8x1xf32>
    %22 = vector.shape_cast %21 : vector<1x8x1xf32> to vector<8x1xf32>
    %c0_19 = arith.constant 0 : index
    %c0_20 = arith.constant 0 : index
    %c0_21 = arith.constant 0 : index
    %23 = vector.load %arg9[%c0_19, %c0_20, %c0_21] : memref<4x8x1xf32, #tpu.memory_space<vmem>>, vector<1x8x1xf32>
    %24 = vector.shape_cast %23 : vector<1x8x1xf32> to vector<8x1xf32>
    %cst_22 = arith.constant dense<0xFF800000> : vector<8xf32>
    %25 = vector.multi_reduction <maximumf>, %20, %cst_22 [1] : vector<8x8xf32> to vector<8xf32>
    %26 = vector.shape_cast %25 : vector<8xf32> to vector<8x1xf32>
    %27 = arith.maximumf %22, %26 : vector<8x1xf32>
    %28 = arith.subf %22, %27 : vector<8x1xf32>
    %29 = math.exp %28 : vector<8x1xf32>
    %30 = vector.broadcast %27 : vector<8x1xf32> to vector<8x8xf32>
    %31 = arith.subf %20, %30 : vector<8x8xf32>
    %32 = math.exp %31 : vector<8x8xf32>
    %33 = arith.mulf %29, %24 : vector<8x1xf32>
    %cst_23 = arith.constant dense<0.000000e+00> : vector<8xf32>
    %34 = vector.multi_reduction <add>, %32, %cst_23 [1] : vector<8x8xf32> to vector<8xf32>
    %35 = vector.shape_cast %34 : vector<8xf32> to vector<8x1xf32>
    %36 = arith.addf %33, %35 : vector<8x1xf32>
    %c0_24 = arith.constant 0 : index
    %c0_25 = arith.constant 0 : index
    %c0_26 = arith.constant 0 : index
    %37 = vector.load %arg9[%c0_24, %c0_25, %c0_26] : memref<4x8x1xf32, #tpu.memory_space<vmem>>, vector<1x8x1xf32>
    %38 = vector.shape_cast %37 : vector<1x8x1xf32> to vector<8x1xf32>
    %39 = vector.shape_cast %36 : vector<8x1xf32> to vector<1x8x1xf32>
    tpu.vector_store %arg9[%c0_24, %c0_25, %c0_26], %39 {strides = array<i32>} : memref<4x8x1xf32, #tpu.memory_space<vmem>>, vector<1x8x1xf32>,
    %40 = arith.truncf %32 : vector<8x8xf32> to vector<8x8xbf16>
    %cst_27 = arith.constant dense<0.000000e+00> : vector<8x8xf32>
    %41 = tpu.matmul %40, %13, %cst_27 {dimension_numbers = #tpu.dot_dimension_numbers<[1], [0], [0], [1], [0, 0, 1, 1], [], []>} : vector<8x8xbf16>, vector<8x8xbf16>, vector<8x8xf32> -> vector<8x8xf32>
    %c0_28 = arith.constant 0 : index
    %c0_29 = arith.constant 0 : index
    %c0_30 = arith.constant 0 : index
    %42 = vector.load %arg10[%c0_28, %c0_29, %c0_30] : memref<4x8x8xf32, #tpu.memory_space<vmem>>, vector<1x8x8xf32>
    %43 = vector.shape_cast %42 : vector<1x8x8xf32> to vector<8x8xf32>
    %44 = vector.broadcast %29 : vector<8x1xf32> to vector<8x8xf32>
    %45 = arith.mulf %44, %43 : vector<8x8xf32>
    %46 = arith.addf %45, %41 : vector<8x8xf32>
    %c0_31 = arith.constant 0 : index
    %c0_32 = arith.constant 0 : index
    %c0_33 = arith.constant 0 : index
    %47 = vector.load %arg10[%c0_31, %c0_32, %c0_33] : memref<4x8x8xf32, #tpu.memory_space<vmem>>, vector<1x8x8xf32>
    %48 = vector.shape_cast %47 : vector<1x8x8xf32> to vector<8x8xf32>
    %49 = vector.shape_cast %46 : vector<8x8xf32> to vector<1x8x8xf32>
    tpu.vector_store %arg10[%c0_31, %c0_32, %c0_33], %49 {strides = array<i32>} : memref<4x8x8xf32, #tpu.memory_space<vmem>>, vector<1x8x8xf32>,
    %c0_34 = arith.constant 0 : index
    %c0_35 = arith.constant 0 : index
    %c0_36 = arith.constant 0 : index
    %50 = vector.load %arg8[%c0_34, %c0_35, %c0_36] : memref<4x8x1xf32, #tpu.memory_space<vmem>>, vector<1x8x1xf32>
    %51 = vector.shape_cast %50 : vector<1x8x1xf32> to vector<8x1xf32>
    %52 = vector.shape_cast %27 : vector<8x1xf32> to vector<1x8x1xf32>
    tpu.vector_store %arg8[%c0_34, %c0_35, %c0_36], %52 {strides = array<i32>} : memref<4x8x1xf32, #tpu.memory_space<vmem>>, vector<1x8x1xf32>,
    %53 = vector.extract_strided_slice %6 {offsets = [0, 8], sizes = [8, 8], strides = [1, 1]} : vector<8x32xbf16> to vector<8x8xbf16>
    %54 = vector.extract_strided_slice %8 {offsets = [0, 8], sizes = [8, 8], strides = [1, 1]} : vector<8x32xbf16> to vector<8x8xbf16>
    %55 = vector.extract_strided_slice %10 {offsets = [0, 8], sizes = [8, 8], strides = [1, 1]} : vector<8x32xbf16> to vector<8x8xbf16>
    %cst_37 = arith.constant dense<0.000000e+00> : vector<8x8xf32>
    %56 = tpu.matmul %53, %54, %cst_37 {dimension_numbers = #tpu.dot_dimension_numbers<[1], [1], [0], [0], [0, 0, 1, 0], [], []>} : vector<8x8xbf16>, vector<8x8xbf16>, vector<8x8xf32> -> vector<8x8xf32>
    %cst_38 = arith.constant 0.353553385 : f32
    %57 = vector.broadcast %cst_38 : f32 to vector<8x8xf32>
    %58 = arith.mulf %56, %57 : vector<8x8xf32>
    %c0_i32_39 = arith.constant 0 : i32
    %59 = vector.broadcast %c0_i32_39 : i32 to vector<8x8xi32>
    %60 = arith.cmpi eq, %4, %59 : vector<8x8xi32>
    %cst_40 = arith.constant -1.000000e+09 : f32
    %61 = vector.broadcast %cst_40 : f32 to vector<8x8xf32>
    %62 = arith.select %60, %61, %58 : vector<8x8xi1>, vector<8x8xf32>
    %c1 = arith.constant 1 : index
    %c0_41 = arith.constant 0 : index
    %c0_42 = arith.constant 0 : index
    %63 = vector.load %arg8[%c1, %c0_41, %c0_42] : memref<4x8x1xf32, #tpu.memory_space<vmem>>, vector<1x8x1xf32>
    %64 = vector.shape_cast %63 : vector<1x8x1xf32> to vector<8x1xf32>
    %c1_43 = arith.constant 1 : index
    %c0_44 = arith.constant 0 : index
    %c0_45 = arith.constant 0 : index
    %65 = vector.load %arg9[%c1_43, %c0_44, %c0_45] : memref<4x8x1xf32, #tpu.memory_space<vmem>>, vector<1x8x1xf32>
    %66 = vector.shape_cast %65 : vector<1x8x1xf32> to vector<8x1xf32>
    %cst_46 = arith.constant dense<0xFF800000> : vector<8xf32>
    %67 = vector.multi_reduction <maximumf>, %62, %cst_46 [1] : vector<8x8xf32> to vector<8xf32>
    %68 = vector.shape_cast %67 : vector<8xf32> to vector<8x1xf32>
    %69 = arith.maximumf %64, %68 : vector<8x1xf32>
    %70 = arith.subf %64, %69 : vector<8x1xf32>
    %71 = math.exp %70 : vector<8x1xf32>
    %72 = vector.broadcast %69 : vector<8x1xf32> to vector<8x8xf32>
    %73 = arith.subf %62, %72 : vector<8x8xf32>
    %74 = math.exp %73 : vector<8x8xf32>
    %75 = arith.mulf %71, %66 : vector<8x1xf32>
    %cst_47 = arith.constant dense<0.000000e+00> : vector<8xf32>
    %76 = vector.multi_reduction <add>, %74, %cst_47 [1] : vector<8x8xf32> to vector<8xf32>
    %77 = vector.shape_cast %76 : vector<8xf32> to vector<8x1xf32>
    %78 = arith.addf %75, %77 : vector<8x1xf32>
    %c1_48 = arith.constant 1 : index
    %c0_49 = arith.constant 0 : index
    %c0_50 = arith.constant 0 : index
    %79 = vector.load %arg9[%c1_48, %c0_49, %c0_50] : memref<4x8x1xf32, #tpu.memory_space<vmem>>, vector<1x8x1xf32>
    %80 = vector.shape_cast %79 : vector<1x8x1xf32> to vector<8x1xf32>
    %81 = vector.shape_cast %78 : vector<8x1xf32> to vector<1x8x1xf32>
    tpu.vector_store %arg9[%c1_48, %c0_49, %c0_50], %81 {strides = array<i32>} : memref<4x8x1xf32, #tpu.memory_space<vmem>>, vector<1x8x1xf32>,
    %82 = arith.truncf %74 : vector<8x8xf32> to vector<8x8xbf16>
    %cst_51 = arith.constant dense<0.000000e+00> : vector<8x8xf32>
    %83 = tpu.matmul %82, %55, %cst_51 {dimension_numbers = #tpu.dot_dimension_numbers<[1], [0], [0], [1], [0, 0, 1, 1], [], []>} : vector<8x8xbf16>, vector<8x8xbf16>, vector<8x8xf32> -> vector<8x8xf32>
    %c1_52 = arith.constant 1 : index
    %c0_53 = arith.constant 0 : index
    %c0_54 = arith.constant 0 : index
    %84 = vector.load %arg10[%c1_52, %c0_53, %c0_54] : memref<4x8x8xf32, #tpu.memory_space<vmem>>, vector<1x8x8xf32>
    %85 = vector.shape_cast %84 : vector<1x8x8xf32> to vector<8x8xf32>
    %86 = vector.broadcast %71 : vector<8x1xf32> to vector<8x8xf32>
    %87 = arith.mulf %86, %85 : vector<8x8xf32>
    %88 = arith.addf %87, %83 : vector<8x8xf32>
    %c1_55 = arith.constant 1 : index
    %c0_56 = arith.constant 0 : index
    %c0_57 = arith.constant 0 : index
    %89 = vector.load %arg10[%c1_55, %c0_56, %c0_57] : memref<4x8x8xf32, #tpu.memory_space<vmem>>, vector<1x8x8xf32>
    %90 = vector.shape_cast %89 : vector<1x8x8xf32> to vector<8x8xf32>
    %91 = vector.shape_cast %88 : vector<8x8xf32> to vector<1x8x8xf32>
    tpu.vector_store %arg10[%c1_55, %c0_56, %c0_57], %91 {strides = array<i32>} : memref<4x8x8xf32, #tpu.memory_space<vmem>>, vector<1x8x8xf32>,
    %c1_58 = arith.constant 1 : index
    %c0_59 = arith.constant 0 : index
    %c0_60 = arith.constant 0 : index
    %92 = vector.load %arg8[%c1_58, %c0_59, %c0_60] : memref<4x8x1xf32, #tpu.memory_space<vmem>>, vector<1x8x1xf32>
    %93 = vector.shape_cast %92 : vector<1x8x1xf32> to vector<8x1xf32>
    %94 = vector.shape_cast %69 : vector<8x1xf32> to vector<1x8x1xf32>
    tpu.vector_store %arg8[%c1_58, %c0_59, %c0_60], %94 {strides = array<i32>} : memref<4x8x1xf32, #tpu.memory_space<vmem>>, vector<1x8x1xf32>,
    %95 = vector.extract_strided_slice %6 {offsets = [0, 16], sizes = [8, 8], strides = [1, 1]} : vector<8x32xbf16> to vector<8x8xbf16>
    %96 = vector.extract_strided_slice %8 {offsets = [0, 16], sizes = [8, 8], strides = [1, 1]} : vector<8x32xbf16> to vector<8x8xbf16>
    %97 = vector.extract_strided_slice %10 {offsets = [0, 16], sizes = [8, 8], strides = [1, 1]} : vector<8x32xbf16> to vector<8x8xbf16>
    %cst_61 = arith.constant dense<0.000000e+00> : vector<8x8xf32>
    %98 = tpu.matmul %95, %96, %cst_61 {dimension_numbers = #tpu.dot_dimension_numbers<[1], [1], [0], [0], [0, 0, 1, 0], [], []>} : vector<8x8xbf16>, vector<8x8xbf16>, vector<8x8xf32> -> vector<8x8xf32>
    %cst_62 = arith.constant 0.353553385 : f32
    %99 = vector.broadcast %cst_62 : f32 to vector<8x8xf32>
    %100 = arith.mulf %98, %99 : vector<8x8xf32>
    %c0_i32_63 = arith.constant 0 : i32
    %101 = vector.broadcast %c0_i32_63 : i32 to vector<8x8xi32>
    %102 = arith.cmpi eq, %4, %101 : vector<8x8xi32>
    %cst_64 = arith.constant -1.000000e+09 : f32
    %103 = vector.broadcast %cst_64 : f32 to vector<8x8xf32>
    %104 = arith.select %102, %103, %100 : vector<8x8xi1>, vector<8x8xf32>
    %c2 = arith.constant 2 : index
    %c0_65 = arith.constant 0 : index
    %c0_66 = arith.constant 0 : index
    %105 = vector.load %arg8[%c2, %c0_65, %c0_66] : memref<4x8x1xf32, #tpu.memory_space<vmem>>, vector<1x8x1xf32>
    %106 = vector.shape_cast %105 : vector<1x8x1xf32> to vector<8x1xf32>
    %c2_67 = arith.constant 2 : index
    %c0_68 = arith.constant 0 : index
    %c0_69 = arith.constant 0 : index
    %107 = vector.load %arg9[%c2_67, %c0_68, %c0_69] : memref<4x8x1xf32, #tpu.memory_space<vmem>>, vector<1x8x1xf32>
    %108 = vector.shape_cast %107 : vector<1x8x1xf32> to vector<8x1xf32>
    %cst_70 = arith.constant dense<0xFF800000> : vector<8xf32>
    %109 = vector.multi_reduction <maximumf>, %104, %cst_70 [1] : vector<8x8xf32> to vector<8xf32>
    %110 = vector.shape_cast %109 : vector<8xf32> to vector<8x1xf32>
    %111 = arith.maximumf %106, %110 : vector<8x1xf32>
    %112 = arith.subf %106, %111 : vector<8x1xf32>
    %113 = math.exp %112 : vector<8x1xf32>
    %114 = vector.broadcast %111 : vector<8x1xf32> to vector<8x8xf32>
    %115 = arith.subf %104, %114 : vector<8x8xf32>
    %116 = math.exp %115 : vector<8x8xf32>
    %117 = arith.mulf %113, %108 : vector<8x1xf32>
    %cst_71 = arith.constant dense<0.000000e+00> : vector<8xf32>
    %118 = vector.multi_reduction <add>, %116, %cst_71 [1] : vector<8x8xf32> to vector<8xf32>
    %119 = vector.shape_cast %118 : vector<8xf32> to vector<8x1xf32>
    %120 = arith.addf %117, %119 : vector<8x1xf32>
    %c2_72 = arith.constant 2 : index
    %c0_73 = arith.constant 0 : index
    %c0_74 = arith.constant 0 : index
    %121 = vector.load %arg9[%c2_72, %c0_73, %c0_74] : memref<4x8x1xf32, #tpu.memory_space<vmem>>, vector<1x8x1xf32>
    %122 = vector.shape_cast %121 : vector<1x8x1xf32> to vector<8x1xf32>
    %123 = vector.shape_cast %120 : vector<8x1xf32> to vector<1x8x1xf32>
    tpu.vector_store %arg9[%c2_72, %c0_73, %c0_74], %123 {strides = array<i32>} : memref<4x8x1xf32, #tpu.memory_space<vmem>>, vector<1x8x1xf32>,
    %124 = arith.truncf %116 : vector<8x8xf32> to vector<8x8xbf16>
    %cst_75 = arith.constant dense<0.000000e+00> : vector<8x8xf32>
    %125 = tpu.matmul %124, %97, %cst_75 {dimension_numbers = #tpu.dot_dimension_numbers<[1], [0], [0], [1], [0, 0, 1, 1], [], []>} : vector<8x8xbf16>, vector<8x8xbf16>, vector<8x8xf32> -> vector<8x8xf32>
    %c2_76 = arith.constant 2 : index
    %c0_77 = arith.constant 0 : index
    %c0_78 = arith.constant 0 : index
    %126 = vector.load %arg10[%c2_76, %c0_77, %c0_78] : memref<4x8x8xf32, #tpu.memory_space<vmem>>, vector<1x8x8xf32>
    %127 = vector.shape_cast %126 : vector<1x8x8xf32> to vector<8x8xf32>
    %128 = vector.broadcast %113 : vector<8x1xf32> to vector<8x8xf32>
    %129 = arith.mulf %128, %127 : vector<8x8xf32>
    %130 = arith.addf %129, %125 : vector<8x8xf32>
    %c2_79 = arith.constant 2 : index
    %c0_80 = arith.constant 0 : index
    %c0_81 = arith.constant 0 : index
    %131 = vector.load %arg10[%c2_79, %c0_80, %c0_81] : memref<4x8x8xf32, #tpu.memory_space<vmem>>, vector<1x8x8xf32>
    %132 = vector.shape_cast %131 : vector<1x8x8xf32> to vector<8x8xf32>
    %133 = vector.shape_cast %130 : vector<8x8xf32> to vector<1x8x8xf32>
    tpu.vector_store %arg10[%c2_79, %c0_80, %c0_81], %133 {strides = array<i32>} : memref<4x8x8xf32, #tpu.memory_space<vmem>>, vector<1x8x8xf32>,
    %c2_82 = arith.constant 2 : index
    %c0_83 = arith.constant 0 : index
    %c0_84 = arith.constant 0 : index
    %134 = vector.load %arg8[%c2_82, %c0_83, %c0_84] : memref<4x8x1xf32, #tpu.memory_space<vmem>>, vector<1x8x1xf32>
    %135 = vector.shape_cast %134 : vector<1x8x1xf32> to vector<8x1xf32>
    %136 = vector.shape_cast %111 : vector<8x1xf32> to vector<1x8x1xf32>
    tpu.vector_store %arg8[%c2_82, %c0_83, %c0_84], %136 {strides = array<i32>} : memref<4x8x1xf32, #tpu.memory_space<vmem>>, vector<1x8x1xf32>,
    %137 = vector.extract_strided_slice %6 {offsets = [0, 24], sizes = [8, 8], strides = [1, 1]} : vector<8x32xbf16> to vector<8x8xbf16>
    %138 = vector.extract_strided_slice %8 {offsets = [0, 24], sizes = [8, 8], strides = [1, 1]} : vector<8x32xbf16> to vector<8x8xbf16>
    %139 = vector.extract_strided_slice %10 {offsets = [0, 24], sizes = [8, 8], strides = [1, 1]} : vector<8x32xbf16> to vector<8x8xbf16>
    %cst_85 = arith.constant dense<0.000000e+00> : vector<8x8xf32>
    %140 = tpu.matmul %137, %138, %cst_85 {dimension_numbers = #tpu.dot_dimension_numbers<[1], [1], [0], [0], [0, 0, 1, 0], [], []>} : vector<8x8xbf16>, vector<8x8xbf16>, vector<8x8xf32> -> vector<8x8xf32>
    %cst_86 = arith.constant 0.353553385 : f32
    %141 = vector.broadcast %cst_86 : f32 to vector<8x8xf32>
    %142 = arith.mulf %140, %141 : vector<8x8xf32>
    %c0_i32_87 = arith.constant 0 : i32
    %143 = vector.broadcast %c0_i32_87 : i32 to vector<8x8xi32>
    %144 = arith.cmpi eq, %4, %143 : vector<8x8xi32>
    %cst_88 = arith.constant -1.000000e+09 : f32
    %145 = vector.broadcast %cst_88 : f32 to vector<8x8xf32>
    %146 = arith.select %144, %145, %142 : vector<8x8xi1>, vector<8x8xf32>
    %c3 = arith.constant 3 : index
    %c0_89 = arith.constant 0 : index
    %c0_90 = arith.constant 0 : index
    %147 = vector.load %arg8[%c3, %c0_89, %c0_90] : memref<4x8x1xf32, #tpu.memory_space<vmem>>, vector<1x8x1xf32>
    %148 = vector.shape_cast %147 : vector<1x8x1xf32> to vector<8x1xf32>
    %c3_91 = arith.constant 3 : index
    %c0_92 = arith.constant 0 : index
    %c0_93 = arith.constant 0 : index
    %149 = vector.load %arg9[%c3_91, %c0_92, %c0_93] : memref<4x8x1xf32, #tpu.memory_space<vmem>>, vector<1x8x1xf32>
    %150 = vector.shape_cast %149 : vector<1x8x1xf32> to vector<8x1xf32>
    %cst_94 = arith.constant dense<0xFF800000> : vector<8xf32>
    %151 = vector.multi_reduction <maximumf>, %146, %cst_94 [1] : vector<8x8xf32> to vector<8xf32>
    %152 = vector.shape_cast %151 : vector<8xf32> to vector<8x1xf32>
    %153 = arith.maximumf %148, %152 : vector<8x1xf32>
    %154 = arith.subf %148, %153 : vector<8x1xf32>
    %155 = math.exp %154 : vector<8x1xf32>
    %156 = vector.broadcast %153 : vector<8x1xf32> to vector<8x8xf32>
    %157 = arith.subf %146, %156 : vector<8x8xf32>
    %158 = math.exp %157 : vector<8x8xf32>
    %159 = arith.mulf %155, %150 : vector<8x1xf32>
    %cst_95 = arith.constant dense<0.000000e+00> : vector<8xf32>
    %160 = vector.multi_reduction <add>, %158, %cst_95 [1] : vector<8x8xf32> to vector<8xf32>
    %161 = vector.shape_cast %160 : vector<8xf32> to vector<8x1xf32>
    %162 = arith.addf %159, %161 : vector<8x1xf32>
    %c3_96 = arith.constant 3 : index
    %c0_97 = arith.constant 0 : index
    %c0_98 = arith.constant 0 : index
    %163 = vector.load %arg9[%c3_96, %c0_97, %c0_98] : memref<4x8x1xf32, #tpu.memory_space<vmem>>, vector<1x8x1xf32>
    %164 = vector.shape_cast %163 : vector<1x8x1xf32> to vector<8x1xf32>
    %165 = vector.shape_cast %162 : vector<8x1xf32> to vector<1x8x1xf32>
    tpu.vector_store %arg9[%c3_96, %c0_97, %c0_98], %165 {strides = array<i32>} : memref<4x8x1xf32, #tpu.memory_space<vmem>>, vector<1x8x1xf32>,
    %166 = arith.truncf %158 : vector<8x8xf32> to vector<8x8xbf16>
    %cst_99 = arith.constant dense<0.000000e+00> : vector<8x8xf32>
    %167 = tpu.matmul %166, %139, %cst_99 {dimension_numbers = #tpu.dot_dimension_numbers<[1], [0], [0], [1], [0, 0, 1, 1], [], []>} : vector<8x8xbf16>, vector<8x8xbf16>, vector<8x8xf32> -> vector<8x8xf32>
    %c3_100 = arith.constant 3 : index
    %c0_101 = arith.constant 0 : index
    %c0_102 = arith.constant 0 : index
    %168 = vector.load %arg10[%c3_100, %c0_101, %c0_102] : memref<4x8x8xf32, #tpu.memory_space<vmem>>, vector<1x8x8xf32>
    %169 = vector.shape_cast %168 : vector<1x8x8xf32> to vector<8x8xf32>
    %170 = vector.broadcast %155 : vector<8x1xf32> to vector<8x8xf32>
    %171 = arith.mulf %170, %169 : vector<8x8xf32>
    %172 = arith.addf %171, %167 : vector<8x8xf32>
    %c3_103 = arith.constant 3 : index
    %c0_104 = arith.constant 0 : index
    %c0_105 = arith.constant 0 : index
    %173 = vector.load %arg10[%c3_103, %c0_104, %c0_105] : memref<4x8x8xf32, #tpu.memory_space<vmem>>, vector<1x8x8xf32>
    %174 = vector.shape_cast %173 : vector<1x8x8xf32> to vector<8x8xf32>
    %175 = vector.shape_cast %172 : vector<8x8xf32> to vector<1x8x8xf32>
    tpu.vector_store %arg10[%c3_103, %c0_104, %c0_105], %175 {strides = array<i32>} : memref<4x8x8xf32, #tpu.memory_space<vmem>>, vector<1x8x8xf32>,
    %c3_106 = arith.constant 3 : index
    %c0_107 = arith.constant 0 : index
    %c0_108 = arith.constant 0 : index
    %176 = vector.load %arg8[%c3_106, %c0_107, %c0_108] : memref<4x8x1xf32, #tpu.memory_space<vmem>>, vector<1x8x1xf32>
    %177 = vector.shape_cast %176 : vector<1x8x1xf32> to vector<8x1xf32>
    %178 = vector.shape_cast %153 : vector<8x1xf32> to vector<1x8x1xf32>
    tpu.vector_store %arg8[%c3_106, %c0_107, %c0_108], %178 {strides = array<i32>} : memref<4x8x1xf32, #tpu.memory_space<vmem>>, vector<1x8x1xf32>,
    %c0_i32_109 = arith.constant 0 : i32
    %179 = arith.cmpi eq, %arg2, %c0_i32_109 : i32
    %180 = arith.extui %179 : i1 to i32
    %c0_i32_110 = arith.constant 0 : i32
    %181 = arith.cmpi ne, %180, %c0_i32_110 : i32
    scf.if %181 {
      %c0_111 = arith.constant 0 : index
      %c0_112 = arith.constant 0 : index
      %c0_113 = arith.constant 0 : index
      %182 = vector.load %arg9[%c0_111, %c0_112, %c0_113] : memref<4x8x1xf32, #tpu.memory_space<vmem>>, vector<1x8x1xf32>
      %183 = vector.shape_cast %182 : vector<1x8x1xf32> to vector<8x1xf32>
      %184 = tpu.reciprocal %183 {approx = true} : vector<8x1xf32> -> vector<8x1xf32>
      %c0_114 = arith.constant 0 : index
      %c0_115 = arith.constant 0 : index
      %c0_116 = arith.constant 0 : index
      %185 = vector.load %arg10[%c0_114, %c0_115, %c0_116] : memref<4x8x8xf32, #tpu.memory_space<vmem>>, vector<1x8x8xf32>
      %186 = vector.shape_cast %185 : vector<1x8x8xf32> to vector<8x8xf32>
      %187 = vector.broadcast %184 : vector<8x1xf32> to vector<8x8xf32>
      %188 = arith.mulf %186, %187 : vector<8x8xf32>
      %c1_117 = arith.constant 1 : index
      %c0_118 = arith.constant 0 : index
      %c0_119 = arith.constant 0 : index
      %189 = vector.load %arg9[%c1_117, %c0_118, %c0_119] : memref<4x8x1xf32, #tpu.memory_space<vmem>>, vector<1x8x1xf32>
      %190 = vector.shape_cast %189 : vector<1x8x1xf32> to vector<8x1xf32>
      %191 = tpu.reciprocal %190 {approx = true} : vector<8x1xf32> -> vector<8x1xf32>
      %c1_120 = arith.constant 1 : index
      %c0_121 = arith.constant 0 : index
      %c0_122 = arith.constant 0 : index
      %192 = vector.load %arg10[%c1_120, %c0_121, %c0_122] : memref<4x8x8xf32, #tpu.memory_space<vmem>>, vector<1x8x8xf32>
      %193 = vector.shape_cast %192 : vector<1x8x8xf32> to vector<8x8xf32>
      %194 = vector.broadcast %191 : vector<8x1xf32> to vector<8x8xf32>
      %195 = arith.mulf %193, %194 : vector<8x8xf32>
      %c2_123 = arith.constant 2 : index
      %c0_124 = arith.constant 0 : index
      %c0_125 = arith.constant 0 : index
      %196 = vector.load %arg9[%c2_123, %c0_124, %c0_125] : memref<4x8x1xf32, #tpu.memory_space<vmem>>, vector<1x8x1xf32>
      %197 = vector.shape_cast %196 : vector<1x8x1xf32> to vector<8x1xf32>
      %198 = tpu.reciprocal %197 {approx = true} : vector<8x1xf32> -> vector<8x1xf32>
      %c2_126 = arith.constant 2 : index
      %c0_127 = arith.constant 0 : index
      %c0_128 = arith.constant 0 : index
      %199 = vector.load %arg10[%c2_126, %c0_127, %c0_128] : memref<4x8x8xf32, #tpu.memory_space<vmem>>, vector<1x8x8xf32>
      %200 = vector.shape_cast %199 : vector<1x8x8xf32> to vector<8x8xf32>
      %201 = vector.broadcast %198 : vector<8x1xf32> to vector<8x8xf32>
      %202 = arith.mulf %200, %201 : vector<8x8xf32>
      %c3_129 = arith.constant 3 : index
      %c0_130 = arith.constant 0 : index
      %c0_131 = arith.constant 0 : index
      %203 = vector.load %arg9[%c3_129, %c0_130, %c0_131] : memref<4x8x1xf32, #tpu.memory_space<vmem>>, vector<1x8x1xf32>
      %204 = vector.shape_cast %203 : vector<1x8x1xf32> to vector<8x1xf32>
      %205 = tpu.reciprocal %204 {approx = true} : vector<8x1xf32> -> vector<8x1xf32>
      %c3_132 = arith.constant 3 : index
      %c0_133 = arith.constant 0 : index
      %c0_134 = arith.constant 0 : index
      %206 = vector.load %arg10[%c3_132, %c0_133, %c0_134] : memref<4x8x8xf32, #tpu.memory_space<vmem>>, vector<1x8x8xf32>
      %207 = vector.shape_cast %206 : vector<1x8x8xf32> to vector<8x8xf32>
      %208 = vector.broadcast %205 : vector<8x1xf32> to vector<8x8xf32>
      %209 = arith.mulf %207, %208 : vector<8x8xf32>
      %210 = tpu.concatenate %188, %195, %202, %209 in 1 : vector<8x8xf32>, vector<8x8xf32>, vector<8x8xf32>, vector<8x8xf32> -> vector<8x32xf32>
      %211 = arith.truncf %210 : vector<8x32xf32> to vector<8x32xbf16>
      %c0_135 = arith.constant 0 : index
      %c0_136 = arith.constant 0 : index
      %c0_137 = arith.constant 0 : index
      %212 = vector.load %arg7[%c0_135, %c0_136, %c0_137] : memref<1x8x32xbf16, #tpu.memory_space<vmem>>, vector<1x8x32xbf16>
      %213 = vector.shape_cast %212 : vector<1x8x32xbf16> to vector<8x32xbf16>
      %214 = vector.shape_cast %211 : vector<8x32xbf16> to vector<1x8x32xbf16>
      tpu.vector_store %arg7[%c0_135, %c0_136, %c0_137], %214 {strides = array<i32>} : memref<1x8x32xbf16, #tpu.memory_space<vmem>>, vector<1x8x32xbf16>,
    } else {
    }
    return
  }
  func.func @transform_0(%arg0: i32, %arg1: i32, %arg2: i32) -> (i32, i32, i32, i32) {
    %c0_i32 = arith.constant 0 : i32
    %c0_i32_0 = arith.constant 0 : i32
    return %arg0, %c0_i32, %arg1, %arg2 : i32, i32, i32, i32
  }
  func.func @transform_1(%arg0: i32, %arg1: i32, %arg2: i32) -> (i32, i32, i32) {
    %c0_i32 = arith.constant 0 : i32
    %c0_i32_0 = arith.constant 0 : i32
    return %arg0, %arg1, %c0_i32 : i32, i32, i32
  }
  func.func @transform_2(%arg0: i32, %arg1: i32, %arg2: i32) -> (i32, i32, i32) {
    %c0_i32 = arith.constant 0 : i32
    %c0_i32_0 = arith.constant 0 : i32
    return %arg0, %arg2, %c0_i32 : i32, i32, i32
  }
  func.func @transform_3(%arg0: i32, %arg1: i32, %arg2: i32) -> (i32, i32, i32) {
    %c0_i32 = arith.constant 0 : i32
    %c0_i32_0 = arith.constant 0 : i32
    return %arg0, %arg2, %c0_i32 : i32, i32, i32
  }
  func.func @transform_4(%arg0: i32, %arg1: i32, %arg2: i32) -> (i32, i32, i32) {
    %c0_i32 = arith.constant 0 : i32
    %c0_i32_0 = arith.constant 0 : i32
    return %arg0, %arg1, %c0_i32 : i32, i32, i32
  }
}

module attributes {stable_mosaic.version = 11 : i64} {
  func.func @_oproj_res_kernel(%arg0: i32, %arg1: memref<16x32xbf16, #tpu.memory_space<vmem>>, %arg2: memref<32x32xbf16, #tpu.memory_space<vmem>>, %arg3: memref<1x32xf32, #tpu.memory_space<vmem>>, %arg4: memref<16x32xf32, #tpu.memory_space<vmem>>, %arg5: memref<16x32xf32, #tpu.memory_space<vmem>>) attributes {dimension_semantics = [#tpu.dimension_semantics<parallel>], iteration_bounds = array<i64: 1>, scalar_prefetch = 0 : i64, scratch_operands = 0 : i64, tpu.core_type = #tpu.core_type<tc>, window_params = [{transform_indices = @transform_0, window_bounds = array<i64: 16, 32>}, {pipeline_mode = #tpu.pipeline_mode<synchronous>, transform_indices = @transform_1, window_bounds = array<i64: 32, 32>}, {pipeline_mode = #tpu.pipeline_mode<synchronous>, transform_indices = @transform_2, window_bounds = array<i64: 1, 32>}, {transform_indices = @transform_3, window_bounds = array<i64: 16, 32>}, {transform_indices = @transform_4, window_bounds = array<i64: 16, 32>}]} {
    %c0 = arith.constant 0 : index
    %c0_0 = arith.constant 0 : index
    %0 = vector.load %arg1[%c0, %c0_0] : memref<16x32xbf16, #tpu.memory_space<vmem>>, vector<16x32xbf16>
    %c0_1 = arith.constant 0 : index
    %c0_2 = arith.constant 0 : index
    %1 = vector.load %arg2[%c0_1, %c0_2] : memref<32x32xbf16, #tpu.memory_space<vmem>>, vector<32x32xbf16>
    %cst = arith.constant dense<0.000000e+00> : vector<16x32xf32>
    %2 = tpu.matmul %0, %1, %cst {dimension_numbers = #tpu.dot_dimension_numbers<[1], [0], [0], [1], [0, 0, 1, 1], [], []>} : vector<16x32xbf16>, vector<32x32xbf16>, vector<16x32xf32> -> vector<16x32xf32>
    %c0_3 = arith.constant 0 : index
    %c0_4 = arith.constant 0 : index
    %3 = vector.load %arg3[%c0_3, %c0_4] : memref<1x32xf32, #tpu.memory_space<vmem>>, vector<1x32xf32>
    %4 = vector.broadcast %3 : vector<1x32xf32> to vector<16x32xf32>
    %5 = arith.addf %2, %4 : vector<16x32xf32>
    %c0_5 = arith.constant 0 : index
    %c0_6 = arith.constant 0 : index
    %6 = vector.load %arg4[%c0_5, %c0_6] : memref<16x32xf32, #tpu.memory_space<vmem>>, vector<16x32xf32>
    %7 = arith.addf %5, %6 : vector<16x32xf32>
    %c0_7 = arith.constant 0 : index
    %c0_8 = arith.constant 0 : index
    %8 = vector.load %arg5[%c0_7, %c0_8] : memref<16x32xf32, #tpu.memory_space<vmem>>, vector<16x32xf32>
    tpu.vector_store %arg5[%c0_7, %c0_8], %7 {strides = array<i32>} : memref<16x32xf32, #tpu.memory_space<vmem>>, vector<16x32xf32>,
    return
  }
  func.func @transform_0(%arg0: i32) -> (i32, i32) {
    %c0_i32 = arith.constant 0 : i32
    %c0_i32_0 = arith.constant 0 : i32
    return %arg0, %c0_i32 : i32, i32
  }
  func.func @transform_1(%arg0: i32) -> (i32, i32) {
    %c0_i32 = arith.constant 0 : i32
    %c0_i32_0 = arith.constant 0 : i32
    %c0_i32_1 = arith.constant 0 : i32
    return %c0_i32, %c0_i32_0 : i32, i32
  }
  func.func @transform_2(%arg0: i32) -> (i32, i32) {
    %c0_i32 = arith.constant 0 : i32
    %c0_i32_0 = arith.constant 0 : i32
    %c0_i32_1 = arith.constant 0 : i32
    return %c0_i32, %c0_i32_0 : i32, i32
  }
  func.func @transform_3(%arg0: i32) -> (i32, i32) {
    %c0_i32 = arith.constant 0 : i32
    %c0_i32_0 = arith.constant 0 : i32
    return %arg0, %c0_i32 : i32, i32
  }
  func.func @transform_4(%arg0: i32) -> (i32, i32) {
    %c0_i32 = arith.constant 0 : i32
    %c0_i32_0 = arith.constant 0 : i32
    return %arg0, %c0_i32 : i32, i32
  }
}

module attributes {stable_mosaic.version = 11 : i64} {
  func.func @_ln_ffn_res_kernel(%arg0: i32, %arg1: i32, %arg2: memref<2xf32, #tpu.memory_space<smem>>, %arg3: memref<16x32xf32, #tpu.memory_space<vmem>>, %arg4: memref<32x64xbf16, #tpu.memory_space<vmem>>, %arg5: memref<1x64xf32, #tpu.memory_space<vmem>>, %arg6: memref<64x32xbf16, #tpu.memory_space<vmem>>, %arg7: memref<1x32xf32, #tpu.memory_space<vmem>>, %arg8: memref<16x32xf32, #tpu.memory_space<vmem>>, %arg9: memref<16x32xf32, #tpu.memory_space<vmem>>, %arg10: memref<16x32xf32, #tpu.memory_space<vmem>>) attributes {dimension_semantics = [#tpu.dimension_semantics<parallel>, #tpu.dimension_semantics<arbitrary>], iteration_bounds = array<i64: 1, 1>, scalar_prefetch = 0 : i64, scratch_operands = 1 : i64, tpu.core_type = #tpu.core_type<tc>, window_params = [{transform_indices = @transform_0, window_bounds = array<i64: 2>}, {transform_indices = @transform_1, window_bounds = array<i64: 16, 32>}, {transform_indices = @transform_2, window_bounds = array<i64: 32, 64>}, {transform_indices = @transform_3, window_bounds = array<i64: 1, 64>}, {transform_indices = @transform_4, window_bounds = array<i64: 64, 32>}, {pipeline_mode = #tpu.pipeline_mode<synchronous>, transform_indices = @transform_5, window_bounds = array<i64: 1, 32>}, {transform_indices = @transform_6, window_bounds = array<i64: 16, 32>}, {transform_indices = @transform_7, window_bounds = array<i64: 16, 32>}]} {
    %c0_i32 = arith.constant 0 : i32
    %0 = arith.cmpi eq, %arg1, %c0_i32 : i32
    %1 = arith.extui %0 : i1 to i32
    %c0_i32_0 = arith.constant 0 : i32
    %2 = arith.cmpi ne, %1, %c0_i32_0 : i32
    scf.if %2 {
      %cst_22 = arith.constant 0.000000e+00 : f32
      %45 = vector.broadcast %cst_22 : f32 to vector<16x32xf32>
      %c0_23 = arith.constant 0 : index
      %c0_24 = arith.constant 0 : index
      %46 = vector.load %arg10[%c0_23, %c0_24] : memref<16x32xf32, #tpu.memory_space<vmem>>, vector<16x32xf32>
      tpu.vector_store %arg10[%c0_23, %c0_24], %45 {strides = array<i32>} : memref<16x32xf32, #tpu.memory_space<vmem>>, vector<16x32xf32>,
    } else {
    }
    %c0 = arith.constant 0 : index
    %c0_1 = arith.constant 0 : index
    %3 = vector.load %arg3[%c0, %c0_1] : memref<16x32xf32, #tpu.memory_space<vmem>>, vector<16x32xf32>
    %cst = arith.constant dense<0.000000e+00> : vector<16xf32>
    %4 = vector.multi_reduction <add>, %3, %cst [1] : vector<16x32xf32> to vector<16xf32>
    %5 = vector.shape_cast %4 : vector<16xf32> to vector<16x1xf32>
    %cst_2 = arith.constant 3.200000e+01 : f32
    %6 = vector.broadcast %cst_2 : f32 to vector<16x1xf32>
    %7 = arith.divf %5, %6 : vector<16x1xf32>
    %8 = vector.broadcast %7 : vector<16x1xf32> to vector<16x32xf32>
    %9 = arith.subf %3, %8 : vector<16x32xf32>
    %10 = arith.mulf %9, %9 : vector<16x32xf32>
    %cst_3 = arith.constant dense<0.000000e+00> : vector<16xf32>
    %11 = vector.multi_reduction <add>, %10, %cst_3 [1] : vector<16x32xf32> to vector<16xf32>
    %12 = vector.shape_cast %11 : vector<16xf32> to vector<16x1xf32>
    %cst_4 = arith.constant 3.100000e+01 : f32
    %13 = vector.broadcast %cst_4 : f32 to vector<16x1xf32>
    %14 = arith.divf %12, %13 : vector<16x1xf32>
    %c0_5 = arith.constant 0 : index
    %15 = memref.load %arg2[%c0_5] : memref<2xf32, #tpu.memory_space<smem>>
    %16 = vector.broadcast %7 : vector<16x1xf32> to vector<16x32xf32>
    %17 = arith.subf %3, %16 : vector<16x32xf32>
    %18 = vector.broadcast %15 : f32 to vector<16x32xf32>
    %19 = arith.mulf %18, %17 : vector<16x32xf32>
    %20 = math.sqrt %14 : vector<16x1xf32>
    %cst_6 = arith.constant 9.99999997E-7 : f32
    %21 = vector.broadcast %cst_6 : f32 to vector<16x1xf32>
    %22 = arith.addf %20, %21 : vector<16x1xf32>
    %23 = vector.broadcast %22 : vector<16x1xf32> to vector<16x32xf32>
    %24 = arith.divf %19, %23 : vector<16x32xf32>
    %c1 = arith.constant 1 : index
    %25 = memref.load %arg2[%c1] : memref<2xf32, #tpu.memory_space<smem>>
    %26 = vector.broadcast %25 : f32 to vector<16x32xf32>
    %27 = arith.addf %24, %26 : vector<16x32xf32>
    %28 = arith.truncf %27 : vector<16x32xf32> to vector<16x32xbf16>
    %c0_7 = arith.constant 0 : index
    %c0_8 = arith.constant 0 : index
    %29 = vector.load %arg4[%c0_7, %c0_8] : memref<32x64xbf16, #tpu.memory_space<vmem>>, vector<32x64xbf16>
    %cst_9 = arith.constant dense<0.000000e+00> : vector<16x64xf32>
    %30 = tpu.matmul %28, %29, %cst_9 {dimension_numbers = #tpu.dot_dimension_numbers<[1], [0], [0], [1], [0, 0, 1, 1], [], []>} : vector<16x32xbf16>, vector<32x64xbf16>, vector<16x64xf32> -> vector<16x64xf32>
    %c0_10 = arith.constant 0 : index
    %c0_11 = arith.constant 0 : index
    %31 = vector.load %arg5[%c0_10, %c0_11] : memref<1x64xf32, #tpu.memory_space<vmem>>, vector<1x64xf32>
    %32 = vector.broadcast %31 : vector<1x64xf32> to vector<16x64xf32>
    %33 = arith.addf %30, %32 : vector<16x64xf32>
    %cst_12 = arith.constant 0.000000e+00 : f32
    %34 = vector.broadcast %cst_12 : f32 to vector<16x64xf32>
    %35 = arith.maximumf %33, %34 : vector<16x64xf32>
    %36 = arith.truncf %35 : vector<16x64xf32> to vector<16x64xbf16>
    %c0_13 = arith.constant 0 : index
    %c0_14 = arith.constant 0 : index
    %37 = vector.load %arg10[%c0_13, %c0_14] : memref<16x32xf32, #tpu.memory_space<vmem>>, vector<16x32xf32>
    %c0_15 = arith.constant 0 : index
    %c0_16 = arith.constant 0 : index
    %38 = vector.load %arg6[%c0_15, %c0_16] : memref<64x32xbf16, #tpu.memory_space<vmem>>, vector<64x32xbf16>
    %cst_17 = arith.constant dense<0.000000e+00> : vector<16x32xf32>
    %39 = tpu.matmul %36, %38, %cst_17 {dimension_numbers = #tpu.dot_dimension_numbers<[1], [0], [0], [1], [0, 0, 1, 1], [], []>} : vector<16x64xbf16>, vector<64x32xbf16>, vector<16x32xf32> -> vector<16x32xf32>
    %40 = arith.addf %37, %39 : vector<16x32xf32>
    %c0_18 = arith.constant 0 : index
    %c0_19 = arith.constant 0 : index
    %41 = vector.load %arg10[%c0_18, %c0_19] : memref<16x32xf32, #tpu.memory_space<vmem>>, vector<16x32xf32>
    tpu.vector_store %arg10[%c0_18, %c0_19], %40 {strides = array<i32>} : memref<16x32xf32, #tpu.memory_space<vmem>>, vector<16x32xf32>,
    %c0_i32_20 = arith.constant 0 : i32
    %42 = arith.cmpi eq, %arg1, %c0_i32_20 : i32
    %43 = arith.extui %42 : i1 to i32
    %c0_i32_21 = arith.constant 0 : i32
    %44 = arith.cmpi ne, %43, %c0_i32_21 : i32
    scf.if %44 {
      %c0_22 = arith.constant 0 : index
      %c0_23 = arith.constant 0 : index
      %45 = vector.load %arg10[%c0_22, %c0_23] : memref<16x32xf32, #tpu.memory_space<vmem>>, vector<16x32xf32>
      %c0_24 = arith.constant 0 : index
      %c0_25 = arith.constant 0 : index
      %46 = vector.load %arg7[%c0_24, %c0_25] : memref<1x32xf32, #tpu.memory_space<vmem>>, vector<1x32xf32>
      %47 = vector.broadcast %46 : vector<1x32xf32> to vector<16x32xf32>
      %48 = arith.addf %45, %47 : vector<16x32xf32>
      %c0_26 = arith.constant 0 : index
      %c0_27 = arith.constant 0 : index
      %49 = vector.load %arg8[%c0_26, %c0_27] : memref<16x32xf32, #tpu.memory_space<vmem>>, vector<16x32xf32>
      %50 = arith.addf %48, %49 : vector<16x32xf32>
      %c0_28 = arith.constant 0 : index
      %c0_29 = arith.constant 0 : index
      %51 = vector.load %arg9[%c0_28, %c0_29] : memref<16x32xf32, #tpu.memory_space<vmem>>, vector<16x32xf32>
      tpu.vector_store %arg9[%c0_28, %c0_29], %50 {strides = array<i32>} : memref<16x32xf32, #tpu.memory_space<vmem>>, vector<16x32xf32>,
    } else {
    }
    return
  }
  func.func @transform_0(%arg0: i32, %arg1: i32) -> i32 {
    %c0_i32 = arith.constant 0 : i32
    %c0_i32_0 = arith.constant 0 : i32
    return %c0_i32 : i32
  }
  func.func @transform_1(%arg0: i32, %arg1: i32) -> (i32, i32) {
    %c0_i32 = arith.constant 0 : i32
    %c0_i32_0 = arith.constant 0 : i32
    return %arg0, %c0_i32 : i32, i32
  }
  func.func @transform_2(%arg0: i32, %arg1: i32) -> (i32, i32) {
    %c0_i32 = arith.constant 0 : i32
    %c0_i32_0 = arith.constant 0 : i32
    return %c0_i32, %arg1 : i32, i32
  }
  func.func @transform_3(%arg0: i32, %arg1: i32) -> (i32, i32) {
    %c0_i32 = arith.constant 0 : i32
    %c0_i32_0 = arith.constant 0 : i32
    return %c0_i32, %arg1 : i32, i32
  }
  func.func @transform_4(%arg0: i32, %arg1: i32) -> (i32, i32) {
    %c0_i32 = arith.constant 0 : i32
    %c0_i32_0 = arith.constant 0 : i32
    return %arg1, %c0_i32 : i32, i32
  }
  func.func @transform_5(%arg0: i32, %arg1: i32) -> (i32, i32) {
    %c0_i32 = arith.constant 0 : i32
    %c0_i32_0 = arith.constant 0 : i32
    %c0_i32_1 = arith.constant 0 : i32
    return %c0_i32, %c0_i32_0 : i32, i32
  }
  func.func @transform_6(%arg0: i32, %arg1: i32) -> (i32, i32) {
    %c0_i32 = arith.constant 0 : i32
    %c0_i32_0 = arith.constant 0 : i32
    return %arg0, %c0_i32 : i32, i32
  }
  func.func @transform_7(%arg0: i32, %arg1: i32) -> (i32, i32) {
    %c0_i32 = arith.constant 0 : i32
    %c0_i32_0 = arith.constant 0 : i32
    return %arg0, %c0_i32 : i32, i32
  }
}

module attributes {stable_mosaic.version = 11 : i64} {
  func.func @kernel(%arg0: i32, %arg1: memref<2xf32, #tpu.memory_space<smem>>, %arg2: memref<16x32xf32, #tpu.memory_space<vmem>>, %arg3: memref<32x32xbf16, #tpu.memory_space<vmem>>, %arg4: memref<1x32xf32, #tpu.memory_space<vmem>>, %arg5: memref<16x32xbf16, #tpu.memory_space<vmem>>) attributes {dimension_semantics = [#tpu.dimension_semantics<parallel>], iteration_bounds = array<i64: 1>, scalar_prefetch = 0 : i64, scratch_operands = 0 : i64, tpu.core_type = #tpu.core_type<tc>, window_params = [{transform_indices = @transform_0, window_bounds = array<i64: 2>}, {transform_indices = @transform_1, window_bounds = array<i64: 16, 32>}, {pipeline_mode = #tpu.pipeline_mode<synchronous>, transform_indices = @transform_2, window_bounds = array<i64: 32, 32>}, {pipeline_mode = #tpu.pipeline_mode<synchronous>, transform_indices = @transform_3, window_bounds = array<i64: 1, 32>}, {transform_indices = @transform_4, window_bounds = array<i64: 16, 32>}]} {
    %c0 = arith.constant 0 : index
    %c0_0 = arith.constant 0 : index
    %0 = vector.load %arg2[%c0, %c0_0] : memref<16x32xf32, #tpu.memory_space<vmem>>, vector<16x32xf32>
    %cst = arith.constant dense<0.000000e+00> : vector<16xf32>
    %1 = vector.multi_reduction <add>, %0, %cst [1] : vector<16x32xf32> to vector<16xf32>
    %2 = vector.shape_cast %1 : vector<16xf32> to vector<16x1xf32>
    %cst_1 = arith.constant 3.200000e+01 : f32
    %3 = vector.broadcast %cst_1 : f32 to vector<16x1xf32>
    %4 = arith.divf %2, %3 : vector<16x1xf32>
    %5 = vector.broadcast %4 : vector<16x1xf32> to vector<16x32xf32>
    %6 = arith.subf %0, %5 : vector<16x32xf32>
    %7 = arith.mulf %6, %6 : vector<16x32xf32>
    %cst_2 = arith.constant dense<0.000000e+00> : vector<16xf32>
    %8 = vector.multi_reduction <add>, %7, %cst_2 [1] : vector<16x32xf32> to vector<16xf32>
    %9 = vector.shape_cast %8 : vector<16xf32> to vector<16x1xf32>
    %cst_3 = arith.constant 3.100000e+01 : f32
    %10 = vector.broadcast %cst_3 : f32 to vector<16x1xf32>
    %11 = arith.divf %9, %10 : vector<16x1xf32>
    %c0_4 = arith.constant 0 : index
    %12 = memref.load %arg1[%c0_4] : memref<2xf32, #tpu.memory_space<smem>>
    %13 = vector.broadcast %4 : vector<16x1xf32> to vector<16x32xf32>
    %14 = arith.subf %0, %13 : vector<16x32xf32>
    %15 = vector.broadcast %12 : f32 to vector<16x32xf32>
    %16 = arith.mulf %15, %14 : vector<16x32xf32>
    %17 = math.sqrt %11 : vector<16x1xf32>
    %cst_5 = arith.constant 9.99999997E-7 : f32
    %18 = vector.broadcast %cst_5 : f32 to vector<16x1xf32>
    %19 = arith.addf %17, %18 : vector<16x1xf32>
    %20 = vector.broadcast %19 : vector<16x1xf32> to vector<16x32xf32>
    %21 = arith.divf %16, %20 : vector<16x32xf32>
    %c1 = arith.constant 1 : index
    %22 = memref.load %arg1[%c1] : memref<2xf32, #tpu.memory_space<smem>>
    %23 = vector.broadcast %22 : f32 to vector<16x32xf32>
    %24 = arith.addf %21, %23 : vector<16x32xf32>
    %25 = arith.truncf %24 : vector<16x32xf32> to vector<16x32xbf16>
    %c0_6 = arith.constant 0 : index
    %c0_7 = arith.constant 0 : index
    %26 = vector.load %arg3[%c0_6, %c0_7] : memref<32x32xbf16, #tpu.memory_space<vmem>>, vector<32x32xbf16>
    %c0_8 = arith.constant 0 : index
    %c0_9 = arith.constant 0 : index
    %27 = vector.load %arg4[%c0_8, %c0_9] : memref<1x32xf32, #tpu.memory_space<vmem>>, vector<1x32xf32>
    %cst_10 = arith.constant dense<0.000000e+00> : vector<16x32xf32>
    %28 = tpu.matmul %25, %26, %cst_10 {dimension_numbers = #tpu.dot_dimension_numbers<[1], [0], [0], [1], [0, 0, 1, 1], [], []>} : vector<16x32xbf16>, vector<32x32xbf16>, vector<16x32xf32> -> vector<16x32xf32>
    %29 = vector.broadcast %27 : vector<1x32xf32> to vector<16x32xf32>
    %30 = arith.addf %28, %29 : vector<16x32xf32>
    %31 = arith.truncf %30 : vector<16x32xf32> to vector<16x32xbf16>
    %c0_11 = arith.constant 0 : index
    %c0_12 = arith.constant 0 : index
    %32 = vector.load %arg5[%c0_11, %c0_12] : memref<16x32xbf16, #tpu.memory_space<vmem>>, vector<16x32xbf16>
    tpu.vector_store %arg5[%c0_11, %c0_12], %31 {strides = array<i32>} : memref<16x32xbf16, #tpu.memory_space<vmem>>, vector<16x32xbf16>,
    return
  }
  func.func @transform_0(%arg0: i32) -> i32 {
    %c0_i32 = arith.constant 0 : i32
    %c0_i32_0 = arith.constant 0 : i32
    return %c0_i32 : i32
  }
  func.func @transform_1(%arg0: i32) -> (i32, i32) {
    %c0_i32 = arith.constant 0 : i32
    %c0_i32_0 = arith.constant 0 : i32
    return %arg0, %c0_i32 : i32, i32
  }
  func.func @transform_2(%arg0: i32) -> (i32, i32) {
    %c0_i32 = arith.constant 0 : i32
    %c0_i32_0 = arith.constant 0 : i32
    %c0_i32_1 = arith.constant 0 : i32
    return %c0_i32, %c0_i32_0 : i32, i32
  }
  func.func @transform_3(%arg0: i32) -> (i32, i32) {
    %c0_i32 = arith.constant 0 : i32
    %c0_i32_0 = arith.constant 0 : i32
    %c0_i32_1 = arith.constant 0 : i32
    return %c0_i32, %c0_i32_0 : i32, i32
  }
  func.func @transform_4(%arg0: i32) -> (i32, i32) {
    %c0_i32 = arith.constant 0 : i32
    %c0_i32_0 = arith.constant 0 : i32
    return %arg0, %c0_i32 : i32, i32
  }
}

</mosaic_0001>

<bundles_post_ra>
// kernel: decoder_block.10
= control target key start
LH: loop header
LB: loop body
LE: loop exit
PB: predicated region body
PF: predicated region fallthrough
CT: control target
= control target key end

     0   :  { %v124_v0 = vmov 0.0   ;;  %vm125_vm0 = vmmov 0   ;;  %vm48_vm1 = vcmask 261120   ;;  %s178_s1 = inlined_call_operand.vmem [shape: bf16[32,32], index: 1, kind: input, shape index: {}]   ;;  %s179_s0 = inlined_call_operand.vmem [shape: bf16[16,32], index: 0, kind: input, shape index: {}]   ;;  %s180_s2 = inlined_call_operand.vmem [shape: f32[1,32], index: 2, kind: input, shape index: {}]   ;;  %s181_s3 = inlined_call_operand.vmem [shape: f32[16,32], index: 3, kind: input, shape index: {}]   ;;  %s182_s4 = inlined_call_operand.vmem [shape: f32[16,32], index: 4, kind: output, shape index: {}]  }
   0x1   :  { %111 = vmatprep.subr.bf16.mxu0 %v124_v0  ;;  %v121_v1 = vld [vmem:[%s178_s1 + $0x8] sm:$0xff]   ;;  %115 = vmatprep.mubr.msk.bf16.mxu0 %vm125_vm0, %v124_v0  ;;  %v122_v2 = vld [vmem:[%s178_s1] sm:$0xff]  }
   0x2   :  { %112 = vmatpush3.bf16.msra.mxu0 %v121_v1  ;;  %v123_v3 = vld [vmem:[%s179_s0] sm:$0xff]   ;;  %v94_v11 = vld [vmem:[%s181_s3 + $0x8] sm:$0xff] }
   0x3   :  { %113 = vmatprep.subr.bf16.mxu0 %v124_v0  ;;  %v103_v4 = vld [vmem:[%s180_s2] ss:$0 sm:$0xff] }
   0x4   :  { %v93_v6 = vld [vmem:[%s181_s3] sm:$0xff] }
   0x6   :  { %114 = vmatpush3.bf16.msra.mxu0 %v122_v2 }
   0x9   :  { %116 = vmatmul.mubr.msk.bf16.vlgmr.msra.gmra.mxu0 %vm48_vm1, %v123_v3 }
  0xc9   :  { %v86_v5 = vpop.f32.mrf.mxu0 }
  0xca   :  { %v87_v7 = vadd.f32 %v103_v4, %v86_v5 }
  0xcb   :  { %v117_v8 = vpop.f32.mrf.mxu0 }
  0xcc   :  { %v95_v9 = vadd.f32 %v93_v6, %v87_v7 }
  0xcd   :  { %v89_v10 = vpop.f32.mrf.mxu0 }
  0xce   :  { %97 = vst.msk [vmem:[%s182_s4] sm:$0xff] %vm48_vm1, %v95_v9  ;;  %v90_v12 = vadd.f32 %v103_v4, %v89_v10 }
  0xcf   :  { %v118_v13 = vpop.f32.mrf.mxu0 }
  0xd0   :  { %v96_v14 = vadd.f32 %v94_v11, %v90_v12 }
  0xd2   :  { %98 = vst.msk [vmem:[%s182_s4 + $0x8] sm:$0xff] %vm48_vm1, %v96_v14 }

// kernel: decoder_block.12
= control target key start
LH: loop header
LB: loop body
LE: loop exit
PB: predicated region body
PF: predicated region fallthrough
CT: control target
= control target key end

     0   :  { %12 = vsyncpa [#allocation3], 0  ;;  %s385_s0 = inlined_call_operand.vmem [shape: f32[16,32], index: 0, kind: input, shape index: {}]   ;;  %s386_s1 = inlined_call_operand.vmem [shape: bf16[32,32], index: 1, kind: input, shape index: {}]   ;;  %s387_s2 = inlined_call_operand.hbm [shape: f32[1,32], index: 2, kind: input, shape index: {}]   ;;  %s388_s3 = inlined_call_operand.hbm [shape: bf16[32,32], index: 3, kind: input, shape index: {}]   ;;  %s389_s4 = inlined_call_operand.vmem [shape: f32[1,32], index: 4, kind: input, shape index: {}]   ;;  %s390_s5 = inlined_call_operand.vmem [shape: bf16[16,32], index: 5, kind: output, shape index: {0}]   ;;  %s391_s6 = inlined_call_operand.vmem [shape: bf16[16,32], index: 6, kind: output, shape index: {1}]  }
   0x1   :  { %13 = vsyncpa [#allocation5], 0  ;;  %s307_s21 = smov [#allocation2]   ;;  %s308_s23 = smov [#allocation4]  }
   0x2   :  { %s24_s22 = sshll.u32 %s307_s21, 4  ;;  %s33_s24 = sshll.u32 %s308_s23, 4  ;;  %s25_s22 = int_to_ptr.vmem [resolvable:$true] %s24_s22  ;;  %s34_s24 = int_to_ptr.vmem [resolvable:$true] %s33_s24 }
   0x3   :  { %s271_s25 = scalar_lea.vmem %s25_s22, 16  ;;  %s275_s26 = scalar_lea.vmem %s25_s22, 32 }
   0x4   :  { %p272_p0 = scmp.ne.s32.totalorder %s25_s22, %s271_s25  ;;  %p276_p1 = scmp.lt.s32.totalorder %s25_s22, %s25_s22 }
   0x5   :  { %p277_p2 = scmp.lt.s32.totalorder %s275_s26, %s271_s25 }
   0x7   :  { %p278_p3 = por %p277_p2, %p276_p1 }
   0x9   :  { %p279_p4 = pnand %p278_p3, %p272_p0 }
   0xb   :  { %282 = shalt.err (!%p279_p4)
}
   0xc   :  { %27 = dma.hbm_to_vmem [thread:$0]  %s387_s2, 16, %s25_s22, [#allocation3]  }
   0xd   :  { %s291_s29 = scalar_lea.vmem %s34_s24, 256  ;;  %p296_p6 = scmp.lt.s32.totalorder %s34_s24, %s34_s24 }
   0xe   :  { %p292_p5 = scmp.ne.s32.totalorder %s34_s24, %s291_s29  ;;  %p297_p7 = scmp.lt.s32.totalorder %s291_s29, %s291_s29 }
  0x10   :  { %p298_p8 = por %p297_p7, %p296_p6 }
  0x12   :  { %p299_p9 = pnand %p298_p8, %p292_p5 }
  0x14   :  { %302 = shalt.err (!%p299_p9)
}
  0x15   :  { %s309_s30 = smov 64   ;;  %s310_s7 = smov 4  }
  0x16   :  { %39 = dma.hbm_to_vmem [thread:$0]  %s388_s3, 256, %s34_s24, [#allocation5], %s309_s30, %s309_s30, %s310_s7  }
  0x17   :  { %303 = dma.done.wait [#allocation3], 16  }
  0x18   :  { %304 = vsyncadd [#allocation3], 4294967280 }
  0x19   :  { %305 = dma.done.wait [#allocation5], 256  }
  0x1a   :  { %306 = vsyncadd [#allocation5], 4294967040  ;;  %v311_v0 = vmov 0.0   ;;  %vm312_vm0 = vmmov 0   ;;  %v259_v1 = vld [vmem:[%s386_s1 + $0x8] sm:$0xff]   ;;  %v261_v3 = vld [vmem:[%s386_s1] sm:$0xff]  }
  0x1b   :  { %237 = vmatprep.subr.bf16.mxu0 %v311_v0  ;;  %245 = vmatprep.subr.bf16.mxu1 %v311_v0  ;;  %v260_v2 = vld [vmem:[#allocation4 + $0x8] sm:$0xff]   ;;  %v262_v4 = vld [vmem:[#allocation4] sm:$0xff]   ;;  %vm75_vm1 = vcmask 261120   ;;  %v215_v8 = vld [vmem:[#allocation2] ss:$0 sm:$0xff]  ;;  %vm128_vm2 = vcmask 257024  }
  0x1c   :  { %241 = vmatprep.mubr.msk.bf16.mxu0 %vm312_vm0, %v311_v0  ;;  %249 = vmatprep.mubr.msk.bf16.mxu1 %vm312_vm0, %v311_v0  ;;  %v49_v5 = vld [vmem:[%s385_s0] sm:$0xff]  ;;  %v50_v6 = vld [vmem:[%s385_s0 + $0x8] sm:$0xff] }
  0x1d   :  { %238 = vmatpush3.bf16.msra.mxu0 %v259_v1  ;;  %246 = vmatpush3.bf16.msra.mxu1 %v260_v2  ;;  %v51_v7 = vpack.c.bf16 %v50_v6, %v49_v5  ;;  %v221_v9 = vld [vmem:[%s389_s4] ss:$0 sm:$0xff] }
  0x1e   :  { %239 = vmatprep.subr.bf16.mxu0 %v311_v0  ;;  %247 = vmatprep.subr.bf16.mxu1 %v311_v0 }
  0x21   :  { %240 = vmatpush3.bf16.msra.mxu0 %v261_v3  ;;  %248 = vmatpush3.bf16.msra.mxu1 %v262_v4 }
  0x24   :  { %242 = vmatmul.mubr.msk.bf16.vlgmr.msra.gmra.mxu0 %vm75_vm1, %v51_v7  ;;  %250 = vmatmul.mubr.msk.bf16.vlgmr.msra.gmra.mxu1 %vm75_vm1, %v51_v7 }
  0xe4   :  { %v113_v10 = vpop.f32.mrf.mxu0  ;;  %v188_v12 = vpop.f32.mrf.mxu1 }
  0xe5   :  { %v114_v11 = vadd.f32 %v215_v8, %v113_v10  ;;  %v189_v13 = vadd.f32 %v221_v9, %v188_v12 }
  0xe6   :  { %v243_v14 = vpop.f32.mrf.mxu0  ;;  %v251_v16 = vpop.f32.mrf.mxu1 }
  0xe7   :  { %v227_v15 = vpack.c.bf16 %v114_v11, %v114_v11  ;;  %v229_v17 = vpack.c.bf16 %v189_v13, %v189_v13 }
  0xe8   :  { %v116_v18 = vpop.f32.mrf.mxu0  ;;  %v191_v20 = vpop.f32.mrf.mxu1 }
  0xe9   :  { %129 = vst.msk [vmem:[%s390_s5] sm:$0xf] %vm128_vm2, %v227_v15  ;;  %v117_v19 = vadd.f32 %v215_v8, %v116_v18  ;;  %203 = vst.msk [vmem:[%s391_s6] sm:$0xf] %vm128_vm2, %v229_v17  ;;  %v192_v21 = vadd.f32 %v221_v9, %v191_v20 }
  0xea   :  { %v244_v22 = vpop.f32.mrf.mxu0  ;;  %v252_v24 = vpop.f32.mrf.mxu1 }
  0xeb   :  { %v228_v23 = vpack.c.bf16 %v117_v19, %v117_v19  ;;  %v230_v25 = vpack.c.bf16 %v192_v21, %v192_v21 }
  0xed   :  { %130 = vst.msk [vmem:[%s390_s5 + $0x4] sm:$0xf] %vm128_vm2, %v228_v23  ;;  %204 = vst.msk [vmem:[%s391_s6 + $0x4] sm:$0xf] %vm128_vm2, %v230_v25 }
  0xee   :  { %213 = vsyncpa [#allocation3], 1 }
  0xef   :  { %214 = vsyncpa [#allocation5], 1 }

// kernel: decoder_block.8
= control target key start
LH: loop header
LB: loop body
LE: loop exit
PB: predicated region body
PF: predicated region fallthrough
CT: control target
= control target key end

     0   :  { %16 = vsyncpa [#allocation3], 0  ;;  %s556_s0 = inlined_call_operand.vmem [shape: f32[2], index: 0, kind: input, shape index: {}]   ;;  %s557_s1 = inlined_call_operand.vmem [shape: f32[16,32], index: 1, kind: input, shape index: {}]   ;;  %s558_s2 = inlined_call_operand.vmem [shape: bf16[32,32], index: 2, kind: input, shape index: {}]   ;;  %s559_s3 = inlined_call_operand.vmem [shape: f32[1,32], index: 3, kind: input, shape index: {}]   ;;  %s560_s4 = inlined_call_operand.vmem [shape: bf16[32,32], index: 4, kind: input, shape index: {}]   ;;  %s561_s5 = inlined_call_operand.vmem [shape: f32[1,32], index: 5, kind: input, shape index: {}]   ;;  %s562_s6 = inlined_call_operand.vmem [shape: bf16[32,32], index: 6, kind: input, shape index: {}]   ;;  %s563_s7 = inlined_call_operand.vmem [shape: f32[1,32], index: 7, kind: input, shape index: {}]   ;;  %s564_s8 = inlined_call_operand.vmem [shape: bf16[16,32], index: 8, kind: output, shape index: {0}]   ;;  %s565_s9 = inlined_call_operand.vmem [shape: bf16[16,32], index: 9, kind: output, shape index: {1}]   ;;  %s566_s10 = inlined_call_operand.vmem [shape: bf16[16,32], index: 10, kind: output, shape index: {2}]  }
   0x1   :  { %s23_s15 = sshll.u32 %s556_s0, 4  ;;  %s24_s15 = int_to_ptr.vmem [resolvable:$true] %s23_s15 }
   0x2   :  { %s414_s16 = scalar_lea.vmem %s24_s15, 16  ;;  %p419_p1 = scmp.lt.s32.totalorder %s24_s15, %s24_s15 }
   0x3   :  { %p415_p0 = scmp.ne.s32.totalorder %s24_s15, %s414_s16  ;;  %p420_p2 = scmp.lt.s32.totalorder %s414_s16, %s414_s16 }
   0x5   :  { %p421_p3 = por %p420_p2, %p419_p1 }
   0x7   :  { %p422_p4 = pnand %p421_p3, %p415_p0 }
   0x9   :  { %425 = shalt.err (!%p422_p4)
}
   0xa   :  { %s428_s17 = smov [#allocation2]  }
   0xb   :  { %26 = dma.vmem_to_smem %s24_s15, 16, %s428_s17, [#allocation3]  }
   0xc   :  { %426 = dma.done.wait [#allocation3], 16  }
   0xd   :  { %427 = vsyncadd [#allocation3], 4294967280 }
   0xe   :  { %44 = sfence }
   0xf   :  { %v46_v0 = vld [vmem:[%s557_s1] sm:$0xff]  ;;  %vm48_vm0 = vcmask 261120   ;;  %v47_v1 = vld [vmem:[%s557_s1 + $0x8] sm:$0xff]  ;;  %v429_v16 = vmov 0.0   ;;  %vm430_vm1 = vmmov 0   ;;  %vm175_vm6 = vcmask 257024  }
  0x10   :  { %v49_v2 = vsel %vm48_vm0, %v46_v0, 0.0  ;;  %v52_v3 = vsel %vm48_vm0, %v47_v1, 0.0  ;;  %v400_v14 = vld [vmem:[%s558_s2 + $0x8] sm:$0xff]   ;;  %373 = vmatprep.subr.bf16.mxu0 %v429_v16  ;;  %381 = vmatprep.subr.bf16.mxu1 %v429_v16  ;;  %v402_v17 = vld [vmem:[%s558_s2] sm:$0xff]   ;;  %s71_s2 = sld [smem:[#allocation2]] }
  0x11   :  { %50 = vadd.xlane.f32.xlu0 %v49_v2  ;;  %v401_v15 = vld [vmem:[%s560_s4 + $0x8] sm:$0xff]   ;;  %374 = vmatpush3.bf16.msra.mxu0 %v400_v14  ;;  %v403_v18 = vld [vmem:[%s560_s4] sm:$0xff]   ;;  %s339_s4 = sld [smem:[#allocation2 + $0x1]] }
  0x12   :  { %382 = vmatpush3.bf16.msra.mxu1 %v401_v15  ;;  %375 = vmatprep.subr.bf16.mxu0 %v429_v16  ;;  %v404_v45 = vld [vmem:[%s562_s6 + $0x8] sm:$0xff]   ;;  %v405_v47 = vld [vmem:[%s562_s6] sm:$0xff]  }
  0x13   :  { %383 = vmatprep.subr.bf16.mxu1 %v429_v16  ;;  %377 = vmatprep.mubr.msk.bf16.mxu0 %vm430_vm1, %v429_v16  ;;  %v340_v48 = vld [vmem:[%s559_s3] ss:$0 sm:$0xff] }
  0x14   :  { %385 = vmatprep.mubr.msk.bf16.mxu1 %vm430_vm1, %v429_v16  ;;  %v346_v49 = vld [vmem:[%s561_s5] ss:$0 sm:$0xff] }
  0x15   :  { %53 = vadd.xlane.f32.xlu0 %v52_v3  ;;  %376 = vmatpush3.bf16.msra.mxu0 %v402_v17 }
  0x16   :  { %384 = vmatpush3.bf16.msra.mxu1 %v403_v18  ;;  %389 = vmatprep.subr.bf16.mxu0 %v429_v16  ;;  %v72_v35 = vstv %s71_s2 }
  0x17   :  { %v96_v41 = vstv %s339_s4 }
  0x9a   :  { %v51_v4 = vpop.xlane.xlu0 %50 }
  0x9b   :  { %v56_v5 = vmul.f32 0.03125, %v51_v4 }
  0x9d   :  { %v58_v6 = vsub.f32 %v46_v0, %v56_v5  ;;  %v352_v0 = vld [vmem:[%s563_s7] ss:$0 sm:$0xff] }
  0x9e   :  { %v54_v7 = vpop.xlane.xlu0 %53 }
  0x9f   :  { %v57_v8 = vmul.f32 0.03125, %v54_v7  ;;  %v60_v9 = vmul.f32 %v58_v6, %v58_v6  ;;  %v73_v37 = vmul.f32 %v72_v35, %v58_v6 }
  0xa1   :  { %v59_v10 = vsub.f32 %v47_v1, %v57_v8  ;;  %v62_v11 = vsel %vm48_vm0, %v60_v9, 0.0 }
  0xa2   :  { %63 = vadd.xlane.f32.xlu1 %v62_v11 }
  0xa3   :  { %v61_v12 = vmul.f32 %v59_v10, %v59_v10  ;;  %v74_v38 = vmul.f32 %v72_v35, %v59_v10 }
  0xa5   :  { %v65_v13 = vsel %vm48_vm0, %v61_v12, 0.0 }
  0xa6   :  { %66 = vadd.xlane.f32.xlu1 %v65_v13 }
 0x12b   :  { %v64_v19 = vpop.xlane.xlu1 %63 }
 0x12c   :  { %v69_v20 = vmul.f32 0.032258064, %v64_v19 }
 0x12e   :  { %406 = vrsqrt.f32 %v69_v20  ;;  %vm77_vm2 = vcmp.eq.f32.partialorder %v69_v20, inf  ;;  %v80_v25 = vand.u32 2147483648, %v69_v20  ;;  %vm79_vm3 = vcmp.eq.f32.partialorder %v69_v20, 0.0 }
 0x12f   :  { %v67_v21 = vpop.xlane.xlu1 %66 }
 0x130   :  { %v70_v22 = vmul.f32 0.032258064, %v67_v21 }
 0x132   :  { %408 = vrsqrt.f32 %v70_v22  ;;  %vm84_vm4 = vcmp.eq.f32.partialorder %v70_v22, inf  ;;  %v87_v31 = vand.u32 2147483648, %v70_v22  ;;  %vm86_vm5 = vcmp.eq.f32.partialorder %v70_v22, 0.0 }
 0x13b   :  { %v407_v23 = vpop.eup %406 }
 0x13c   :  { %v76_v24 = vmul.f32 %v407_v23, %v69_v20 }
 0x13e   :  { %v78_v26 = vsel %vm77_vm2, %v69_v20, %v76_v24 }
 0x13f   :  { %v409_v27 = vpop.eup %408  ;;  %v81_v28 = vsel %vm79_vm3, %v80_v25, %v78_v26 }
 0x140   :  { %v89_v29 = vadd.f32 1e-06, %v81_v28  ;;  %v83_v30 = vmul.f32 %v409_v27, %v70_v22 }
 0x142   :  { %410 = vrcp.f32 %v89_v29  ;;  %v85_v32 = vsel %vm84_vm4, %v70_v22, %v83_v30 }
 0x143   :  { %v88_v33 = vsel %vm86_vm5, %v87_v31, %v85_v32 }
 0x144   :  { %v90_v34 = vadd.f32 1e-06, %v88_v33 }
 0x146   :  { %412 = vrcp.f32 %v90_v34 }
 0x14f   :  { %v411_v36 = vpop.eup %410 }
 0x150   :  { %v92_v39 = vmul.f32 %v411_v36, %v73_v37 }
 0x152   :  { %v97_v43 = vadd.f32 %v96_v41, %v92_v39 }
 0x153   :  { %v413_v40 = vpop.eup %412 }
 0x154   :  { %v94_v42 = vmul.f32 %v413_v40, %v74_v38 }
 0x156   :  { %v98_v44 = vadd.f32 %v96_v41, %v94_v42 }
 0x158   :  { %v99_v46 = vpack.c.bf16 %v98_v44, %v97_v43 }
 0x15a   :  { %378 = vmatmul.mubr.msk.bf16.vlgmr.msra.gmra.mxu0 %vm48_vm0, %v99_v46  ;;  %386 = vmatmul.mubr.msk.bf16.vlgmr.msra.gmra.mxu1 %vm48_vm0, %v99_v46 }
 0x15b   :  { %390 = vmatpush3.bf16.msra.mxu0 %v404_v45  ;;  %393 = vmatprep.mubr.msk.bf16.mxu0 %vm430_vm1, %v429_v16 }
 0x15c   :  { %391 = vmatprep.subr.bf16.mxu0 %v429_v16 }
 0x15f   :  { %392 = vmatpush3.bf16.msra.mxu0 %v405_v47 }
 0x162   :  { %394 = vmatmul.mubr.msk.bf16.vlgmr.msra.gmra.mxu0 %vm48_vm0, %v99_v46 }
 0x21a   :  { %v160_v50 = vpop.f32.mrf.mxu0  ;;  %v235_v51 = vpop.f32.mrf.mxu1 }
 0x21b   :  { %v161_v52 = vadd.f32 %v340_v48, %v160_v50  ;;  %v236_v53 = vadd.f32 %v346_v49, %v235_v51 }
 0x21c   :  { %v379_v54 = vpop.f32.mrf.mxu0  ;;  %v387_v55 = vpop.f32.mrf.mxu1 }
 0x21d   :  { %v358_v56 = vpack.c.bf16 %v161_v52, %v161_v52  ;;  %v360_v57 = vpack.c.bf16 %v236_v53, %v236_v53 }
 0x21e   :  { %v163_v58 = vpop.f32.mrf.mxu0  ;;  %v238_v59 = vpop.f32.mrf.mxu1 }
 0x21f   :  { %176 = vst.msk [vmem:[%s564_s8] sm:$0xf] %vm175_vm6, %v358_v56  ;;  %250 = vst.msk [vmem:[%s565_s9] sm:$0xf] %vm175_vm6, %v360_v57  ;;  %v164_v60 = vadd.f32 %v340_v48, %v163_v58  ;;  %v239_v61 = vadd.f32 %v346_v49, %v238_v59 }
 0x220   :  { %v380_v62 = vpop.f32.mrf.mxu0  ;;  %v388_v63 = vpop.f32.mrf.mxu1 }
 0x221   :  { %v359_v1 = vpack.c.bf16 %v164_v60, %v164_v60  ;;  %v361_v2 = vpack.c.bf16 %v239_v61, %v239_v61 }
 0x222   :  { %v309_v3 = vpop.f32.mrf.mxu0 }
 0x223   :  { %177 = vst.msk [vmem:[%s564_s8 + $0x4] sm:$0xf] %vm175_vm6, %v359_v1  ;;  %251 = vst.msk [vmem:[%s565_s9 + $0x4] sm:$0xf] %vm175_vm6, %v361_v2  ;;  %v310_v4 = vadd.f32 %v352_v0, %v309_v3 }
 0x224   :  { %v395_v5 = vpop.f32.mrf.mxu0 }
 0x225   :  { %v362_v6 = vpack.c.bf16 %v310_v4, %v310_v4 }
 0x226   :  { %v312_v7 = vpop.f32.mrf.mxu0 }
 0x227   :  { %324 = vst.msk [vmem:[%s566_s10] sm:$0xf] %vm175_vm6, %v362_v6  ;;  %v313_v8 = vadd.f32 %v352_v0, %v312_v7 }
 0x228   :  { %v396_v9 = vpop.f32.mrf.mxu0 }
 0x229   :  { %v363_v10 = vpack.c.bf16 %v313_v8, %v313_v8 }
 0x22b   :  { %325 = vst.msk [vmem:[%s566_s10 + $0x4] sm:$0xf] %vm175_vm6, %v363_v10 }
 0x22c   :  { %338 = vsyncpa [#allocation3], 1 }

// kernel: decoder_block.9
= control target key start
LH: loop header
LB: loop body
LE: loop exit
PB: predicated region body
PF: predicated region fallthrough
CT: control target
= control target key end

     0   :  { %s1293_s15 = smov 0   ;;  %s1295_s16 = smov 0   ;;  %s1467_s0 = inlined_call_operand.vmem [shape: s32[2,1,8,8], index: 0, kind: input, shape index: {}]   ;;  %s1468_s1 = inlined_call_operand.vmem [shape: bf16[2,8,32], index: 1, kind: input, shape index: {}]   ;;  %s1469_s2 = inlined_call_operand.vmem [shape: bf16[2,8,32], index: 2, kind: input, shape index: {}]   ;;  %s1470_s3 = inlined_call_operand.vmem [shape: bf16[2,8,32], index: 3, kind: input, shape index: {}]   ;;  %s1471_s4 = inlined_call_operand.vmem [shape: bf16[2,8,32], index: 4, kind: output, shape index: {}]  }
   0x1   :  { %s1297_s17 = smov 0  }
   0x2 LB: > { %s33_s18 = sadd.s32 1, %s1252_s16  ;;  %p1089_p0 = scmp.ge.s32.totalorder %s1256_s17, 1  ;;  %s1256_s17 = sphi %s1297_s17, %s14_s17   ;;  %s1252_s16 = sphi %s1295_s16, %s1473_s16   ;;  %s1248_s15 = sphi %s1293_s15, %s1472_s15  }
   0x3   : > { %p35_p1 = scmp.ge.s32.totalorder %s33_s18, 2  ;;  %p234_p2 = scmp.lt.s32.totalorder %s1256_s17, 3 }
   0x5   : > { %s1475_s18 = smov (%p35_p1, %s33_s18), 0  ;;  %p235_p3 = pnand %p1089_p0, %p234_p2 }
   0x6   : > { %p288_p4 = scmp.lt.s32.totalorder (!%p235_p3), %s1248_s15, 1  ;;  %s1262_s30 = smov (!%p235_p3), 120  }
   0x7   : > { %238 = sbr.rel (%p235_p3) target bundleno = 1416 (0x588), region = 36  ;;  %s1263_s5 = smov (!%p235_p3), 112  }
   0x8   : > { %s1264_s6 = smov (!%p235_p3), 104   ;;  %s1265_s10 = smov (!%p235_p3), 8  }
   0x9   : > { %s1266_s11 = smov (!%p235_p3), 16   ;;  %s1267_s12 = smov (!%p235_p3), 24  }
   0xc   : > { %vm340_vm0 = vcmask 64512   ;;  %v1258_v0 = vmov 0.0   ;;  %vm1259_vm1 = vmmov 0   ;;  %s1477_s15 = smov (!%p288_p4, %s1248_s15), 1  ;;  %vm331_vm2 = vcmask 7168  }
   0xd   : > { %1124 = vmatprep.subr.bf16.mxu0 %v1258_v0  ;;  %341 = vst.msk [vmem:[#allocation4] sm:$0xff] %vm340_vm0, %v1258_v0  ;;  %342 = vst.msk [vmem:[#allocation4 + $0x8] sm:$0xff] %vm340_vm0, %v1258_v0  ;;  %1126 = vmatprep.mubr.msk.bf16.mxu0 %vm1259_vm1, %v1258_v0  ;;  %s1325_s19 = sshll.u32 %s1477_s15, 2  ;;  %v1260_v4 = vmov -inf   ;;  %s1090_s26 = sshll.u32 %s1477_s15, 3  ;;  %v1261_v13 = vmov 0  }
   0xe   : > { %343 = vst.msk [vmem:[#allocation4 + $0x10] sm:$0xff] %vm340_vm0, %v1258_v0  ;;  %344 = vst.msk [vmem:[#allocation4 + $0x18] sm:$0xff] %vm340_vm0, %v1258_v0  ;;  %1130 = vmatprep.subr.bf16.mxu1 %v1258_v0  ;;  %1132 = vmatprep.mubr.msk.bf16.mxu1 %vm1259_vm1, %v1258_v0  ;;  %s311_s22 = scalar_lea.vmem %s1469_s2, %s1325_s19  ;;  %s304_s25 = scalar_lea.vmem %s1468_s1, %s1325_s19  ;;  %vm427_vm4 = vcmask 1043456   ;;  %vm953_vm5 = vcmask 130048   ;;  %vm955_vm6 = vcmask 195584   ;;  %vm958_vm7 = vcmask 257024  }
   0xf   : > { %v347_v1 = vld [vmem:[%s311_s22] sm:$0xf]  ;;  %332 = vst.msk [vmem:[#allocation2] sm:$0xff] %vm331_vm2, %v1260_v4  ;;  %333 = vst.msk [vmem:[#allocation2 + $0x8] sm:$0xff] %vm331_vm2, %v1260_v4  ;;  %s297_s29 = scalar_lea.vmem %s1467_s0, %s1090_s26  ;;  %1206 = vset.pattern.permute.xlu0 %v1261_v13  ;;  %1207 = vset.pattern.permute.xlu1 %v1261_v13  ;;  %s318_s9 = scalar_lea.vmem %s1470_s3, %s1325_s19 }
  0x10   : > { %v354_v2 = vsel %vm340_vm0, %v347_v1, 0  ;;  %v346_v3 = vld [vmem:[%s304_s25] sm:$0xf]  ;;  %334 = vst.msk [vmem:[#allocation2 + $0x10] sm:$0xff] %vm331_vm2, %v1260_v4  ;;  %335 = vst.msk [vmem:[#allocation2 + $0x18] sm:$0xff] %vm331_vm2, %v1260_v4  ;;  %v1098_v14 = vcombine.low %v347_v1, %v347_v1  ;;  %s325_s15 = scalar_lea.vmem %s1471_s4, %s1325_s19 }
  0x11   : > { %1125 = vmatpush3.bf16.xpose.msra.mxu0 %v354_v2  ;;  %336 = vst.msk [vmem:[#allocation3] sm:$0xff] %vm331_vm2, %v1258_v0  ;;  %337 = vst.msk [vmem:[#allocation3 + $0x8] sm:$0xff] %vm331_vm2, %v1258_v0  ;;  %v1355_v5 = vld [vmem:[%s297_s29] sm:$0xff]  ;;  %v1097_v15 = vcombine.low %v346_v3, %v346_v3 }
  0x12   : > { %1142 = vmatprep.subr.bf16.mxu0 %v1258_v0  ;;  %338 = vst.msk [vmem:[#allocation3 + $0x10] sm:$0xff] %vm331_vm2, %v1258_v0  ;;  %339 = vst.msk [vmem:[#allocation3 + $0x18] sm:$0xff] %vm331_vm2, %v1258_v0  ;;  %vm397_vm3 = vcmp.eq.s32.totalorder %v1355_v5, 0  ;;  %489 = vrot.lane.b32.xlu1 %v1098_v14, %s1262_s30  ;;  %v1381_v20 = vld [vmem:[%s318_s9] sm:$0xf] }
  0x13   : > { %v429_v21 = vsel %vm427_vm4, %v1381_v20, 0 }
  0x14   : > { %1131 = vmatpush3.bf16.msra.mxu1 %v429_v21 }
  0x15   : > { %1136 = vmatprep.subr.bf16.mxu1 %v1258_v0 }
  0x16   : > { %484 = vrot.lane.b32.xlu1 %v1097_v15, %s1262_s30  ;;  %v1367_v16 = vld [vmem:[#allocation2] sm:$0xff]  ;;  %v540_v61 = vld [vmem:[#allocation2 + $0x8] sm:$0xff] }
  0x17   : > { %v680_v2 = vld [vmem:[#allocation2 + $0x10] sm:$0xff]  ;;  %v817_v5 = vld [vmem:[#allocation2 + $0x18] sm:$0xff] }
  0x18   : > { %1127 = vmatmul.mubr.msk.bf16.vlgmr.msra.gmra.mxu0 %vm340_vm0, %v346_v3 }
  0x19   : > { %1144 = vmatprep.mubr.msk.bf16.mxu0 %vm1259_vm1, %v1258_v0 }
  0x1a   : > { %629 = vrot.lane.b32.xlu1 %v1098_v14, %s1263_s5 }
  0x1e   : > { %627 = vrot.lane.b32.xlu1 %v1097_v15, %s1263_s5 }
  0x22   : > { %766 = vrot.lane.b32.xlu1 %v1098_v14, %s1264_s6 }
  0x26   : > { %764 = vrot.lane.b32.xlu1 %v1097_v15, %s1264_s6 }
  0x84   : > { %v490_v25 = vpop.permute.xlu1 %489 }
  0x85   : > { %v495_v28 = vsel %vm340_vm0, %v490_v25, 0 }
  0x88   : > { %v485_v26 = vpop.permute.xlu1 %484 }
  0x8c   : > { %v630_v30 = vpop.permute.xlu1 %629 }
  0x8d   : > { %v635_v32 = vsel %vm340_vm0, %v630_v30, 0 }
  0x90   : > { %v628_v31 = vpop.permute.xlu1 %627 }
  0x94   : > { %v767_v33 = vpop.permute.xlu1 %766 }
  0x95   : > { %v772_v34 = vsel %vm340_vm0, %v767_v33, 0 }
  0x98   : > { %v765_v35 = vpop.permute.xlu1 %764 }
  0xd8   : > { %v390_v6 = vpop.f32.mrf.mxu0 }
  0xd9   : > { %v396_v7 = vmul.f32 0.35355338, %v390_v6 }
  0xda   : > { %v1128_v8 = vpop.f32.mrf.mxu0 }
  0xdb   : > { %v398_v9 = vsel %vm397_vm3, -1e+09, %v396_v7 }
  0xdc   : > { %v393_v10 = vpop.f32.mrf.mxu0  ;;  %v401_v11 = vsel %vm340_vm0, %v398_v9, -inf }
  0xdd   : > { %402 = vmax.xlane.f32.xlu0 %v401_v11 }
  0xde   : > { %v1129_v12 = vpop.f32.mrf.mxu0 }
 0x166   : > { %v403_v17 = vpop.xlane.xlu0 %402 }
 0x167   : > { %v1370_v18 = vmax.f32 %v1367_v16, %v403_v17 }
 0x169   : > { %v405_v19 = vsub.f32 %v1367_v16, %v1370_v18  ;;  %480 = vst.msk [vmem:[#allocation2] sm:$0xff] %vm331_vm2, %v1370_v18  ;;  %410 = vperm.xlu0 %1206, %v1370_v18  }
 0x1e4   : > { %v411_v22 = vpop.permute.xlu0 %410 }
 0x1e5   : > { %v413_v23 = vsub.f32 %v398_v9, %v411_v22  ;;  %v1100_v9 = vcombine.low %v1381_v20, %v1381_v20 }
 0x1e7   : > { %v414_v24 = vmul.f32 1.442695, %v413_v23 }
 0x1e9   : > { %1210 = vpow2.f32 %v414_v24 }
 0x1f6   : > { %v1386_v27 = vpop.eup %1210 }
 0x1f7   : > { %v423_v29 = vpack.c.bf16 %v1386_v27, %v1386_v27 }
 0x1f9   : > { %1133 = vmatmul.mubr.msk.bf16.vlgmr.msra.gmra.mxu1 %vm340_vm0, %v423_v29  ;;  %v417_v29 = vsel %vm340_vm0, %v1386_v27, 0.0 }
 0x1fa   : > { %1137 = vmatpush3.bf16.xpose.msra.mxu1 %v495_v28  ;;  %1138 = vmatprep.mubr.msk.bf16.mxu1 %vm1259_vm1, %v1258_v0 }
 0x1fb   : > { %1148 = vmatprep.subr.bf16.mxu1 %v1258_v0 }
 0x201   : > { %1139 = vmatmul.mubr.msk.bf16.vlgmr.msra.gmra.mxu1 %vm340_vm0, %v485_v26 }
 0x202   : > { %1149 = vmatpush3.bf16.xpose.msra.mxu1 %v635_v32  ;;  %1150 = vmatprep.mubr.msk.bf16.mxu1 %vm1259_vm1, %v1258_v0 }
 0x203   : > { %1160 = vmatprep.subr.bf16.mxu1 %v1258_v0 }
 0x209   : > { %1151 = vmatmul.mubr.msk.bf16.vlgmr.msra.gmra.mxu1 %vm340_vm0, %v628_v31 }
 0x20a   : > { %1161 = vmatpush3.bf16.xpose.msra.mxu1 %v772_v34  ;;  %1162 = vmatprep.mubr.msk.bf16.mxu1 %vm1259_vm1, %v1258_v0 }
 0x211   : > { %1163 = vmatmul.mubr.msk.bf16.vlgmr.msra.gmra.mxu1 %vm340_vm0, %v765_v35 }
 0x2b9   : > { %v1405_v36 = vpop.f32.mrf.mxu1 }
 0x2bb   : > { %v1134_v37 = vpop.f32.mrf.mxu1 }
 0x2bd   : > { %v468_v38 = vpop.f32.mrf.mxu1 }
 0x2bf   : > { %v1135_v39 = vpop.f32.mrf.mxu1 }
 0x2c1   : > { %v531_v40 = vpop.f32.mrf.mxu1 }
 0x2c2   : > { %v537_v41 = vmul.f32 0.35355338, %v531_v40 }
 0x2c3   : > { %v1140_v42 = vpop.f32.mrf.mxu1 }
 0x2c4   : > { %v538_v43 = vsel %vm397_vm3, -1e+09, %v537_v41 }
 0x2c5   : > { %v534_v44 = vpop.f32.mrf.mxu1  ;;  %v543_v45 = vsel %vm340_vm0, %v538_v43, -inf }
 0x2c6   : > { %544 = vmax.xlane.f32.xlu1 %v543_v45 }
 0x2c7   : > { %v1141_v46 = vpop.f32.mrf.mxu1 }
 0x2c9   : > { %v671_v47 = vpop.f32.mrf.mxu1 }
 0x2ca   : > { %v677_v48 = vmul.f32 0.35355338, %v671_v47  ;;  %v542_v47 = vld [vmem:[#allocation3 + $0x8] sm:$0xff] }
 0x2cb   : > { %v1152_v49 = vpop.f32.mrf.mxu1 }
 0x2cc   : > { %v678_v50 = vsel %vm397_vm3, -1e+09, %v677_v48 }
 0x2cd   : > { %v674_v51 = vpop.f32.mrf.mxu1  ;;  %v683_v52 = vsel %vm340_vm0, %v678_v50, -inf }
 0x2ce   : > { %684 = vmax.xlane.f32.xlu0 %v683_v52 }
 0x2cf   : > { %v1153_v53 = vpop.f32.mrf.mxu1 }
 0x2d1   : > { %v808_v54 = vpop.f32.mrf.mxu1 }
 0x2d2   : > { %v814_v55 = vmul.f32 0.35355338, %v808_v54 }
 0x2d3   : > { %v1164_v56 = vpop.f32.mrf.mxu1 }
 0x2d4   : > { %v815_v57 = vsel %vm397_vm3, -1e+09, %v814_v55 }
 0x2d5   : > { %v811_v58 = vpop.f32.mrf.mxu1  ;;  %v820_v59 = vsel %vm340_vm0, %v815_v57, -inf }
 0x2d6   : > { %821 = vmax.xlane.f32.xlu1 %v820_v59 }
 0x2d7   : > { %v1165_v60 = vpop.f32.mrf.mxu1 }
 0x34f   : > { %v545_v62 = vpop.xlane.xlu1 %544 }
 0x350   : > { %v546_v63 = vmax.f32 %v540_v61, %v545_v62 }
 0x352   : > { %v547_v1 = vsub.f32 %v540_v61, %v546_v63  ;;  %626 = vst.msk [vmem:[#allocation2 + $0x8] sm:$0xff] %vm331_vm2, %v546_v63  ;;  %552 = vperm.xlu1 %1207, %v546_v63   ;;  %v471_v63 = vld [vmem:[#allocation4] sm:$0xff] }
 0x354   : > { %v548_v28 = vmul.f32 1.442695, %v547_v1 }
 0x357   : > { %v685_v3 = vpop.xlane.xlu0 %684 }
 0x358   : > { %v686_v4 = vmax.f32 %v680_v2, %v685_v3 }
 0x35a   : > { %v687_v6 = vsub.f32 %v680_v2, %v686_v4  ;;  %763 = vst.msk [vmem:[#allocation2 + $0x10] sm:$0xff] %vm331_vm2, %v686_v4  ;;  %692 = vperm.xlu0 %1206, %v686_v4  }
 0x35c   : > { %v688_v34 = vmul.f32 1.442695, %v687_v6 }
 0x35f   : > { %v822_v7 = vpop.xlane.xlu1 %821 }
 0x360   : > { %v823_v8 = vmax.f32 %v817_v5, %v822_v7 }
 0x362   : > { %v824_v10 = vsub.f32 %v817_v5, %v823_v8  ;;  %900 = vst.msk [vmem:[#allocation2 + $0x18] sm:$0xff] %vm331_vm2, %v823_v8  ;;  %829 = vperm.xlu1 %1207, %v823_v8  }
 0x364   : > { %v825_v45 = vmul.f32 1.442695, %v824_v10 }
 0x366   : > { %568 = vrot.lane.b32.xlu1 %v1100_v9, %s1262_s30 }
 0x36a   : > { %705 = vrot.lane.b32.xlu1 %v1100_v9, %s1263_s5 }
 0x36e   : > { %842 = vrot.lane.b32.xlu1 %v1100_v9, %s1264_s6  ;;  %v617_v9 = vld [vmem:[#allocation4 + $0x8] sm:$0xff] }
 0x3cd   : > { %v553_v11 = vpop.permute.xlu1 %552 }
 0x3ce   : > { %v555_v12 = vsub.f32 %v538_v43, %v553_v11  ;;  %v406_v43 = vmul.f32 1.442695, %v405_v19  ;;  %v682_v19 = vld [vmem:[#allocation3 + $0x10] sm:$0xff] }
 0x3d0   : > { %v556_v13 = vmul.f32 1.442695, %v555_v12 }
 0x3d2   : > { %1212 = vpow2.f32 %v556_v13 }
 0x3d5   : > { %v693_v14 = vpop.permute.xlu0 %692 }
 0x3d6   : > { %v695_v15 = vsub.f32 %v678_v50, %v693_v14  ;;  %v400_v50 = vld [vmem:[#allocation3] sm:$0xff] }
 0x3d8   : > { %v696_v17 = vmul.f32 1.442695, %v695_v15  ;;  %v754_v15 = vld [vmem:[#allocation4 + $0x10] sm:$0xff] }
 0x3da   : > { %1214 = vpow2.f32 %v696_v17 }
 0x3dd   : > { %v830_v21 = vpop.permute.xlu1 %829 }
 0x3de   : > { %v832_v20 = vsub.f32 %v815_v57, %v830_v21  ;;  %v819_v57 = vld [vmem:[#allocation3 + $0x18] sm:$0xff] }
 0x3df   : > { %v1213_v22 = vpop.eup %1212 }
 0x3e0   : > { %v833_v23 = vmul.f32 1.442695, %v832_v20  ;;  %v559_v24 = vsel %vm340_vm0, %v1213_v22, 0.0  ;;  %v564_v30 = vpack.c.bf16 %v1213_v22, %v1213_v22 }
 0x3e1   : > { %560 = vadd.xlane.f32.xlu1 %v559_v24  ;;  %v569_v25 = vpop.permute.xlu1 %568 }
 0x3e2   : > { %1216 = vpow2.f32 %v833_v23  ;;  %v574_v26 = vsel %vm427_vm4, %v569_v25, 0  ;;  %v891_v25 = vld [vmem:[#allocation4 + $0x18] sm:$0xff] }
 0x3e3   : > { %1143 = vmatpush3.bf16.msra.mxu0 %v574_v26  ;;  %1218 = vpow2.f32 %v548_v28 }
 0x3e4   : > { %1154 = vmatprep.subr.bf16.mxu0 %v1258_v0  ;;  %1220 = vpow2.f32 %v688_v34 }
 0x3e5   : > { %418 = vadd.xlane.f32.xlu1 %v417_v29  ;;  %v706_v31 = vpop.permute.xlu1 %705  ;;  %1222 = vpow2.f32 %v406_v43 }
 0x3e6   : > { %1145 = vmatmul.mubr.msk.bf16.vlgmr.msra.gmra.mxu0 %vm340_vm0, %v564_v30  ;;  %v711_v32 = vsel %vm427_vm4, %v706_v31, 0  ;;  %1224 = vpow2.f32 %v825_v45 }
 0x3e7   : > { %v1215_v33 = vpop.eup %1214  ;;  %1155 = vmatpush3.bf16.msra.mxu0 %v711_v32  ;;  %1156 = vmatprep.mubr.msk.bf16.mxu0 %vm1259_vm1, %v1258_v0 }
 0x3e8   : > { %v699_v35 = vsel %vm340_vm0, %v1215_v33, 0.0  ;;  %1166 = vmatprep.subr.bf16.mxu0 %v1258_v0  ;;  %v704_v37 = vpack.c.bf16 %v1215_v33, %v1215_v33 }
 0x3e9   : > { %700 = vadd.xlane.f32.xlu0 %v699_v35  ;;  %v843_v27 = vpop.permute.xlu1 %842 }
 0x3ea   : > { %v848_v38 = vsel %vm427_vm4, %v843_v27, 0 }
 0x3ee   : > { %1157 = vmatmul.mubr.msk.bf16.vlgmr.msra.gmra.mxu0 %vm340_vm0, %v704_v37 }
 0x3ef   : > { %v1217_v39 = vpop.eup %1216  ;;  %1167 = vmatpush3.bf16.msra.mxu0 %v848_v38  ;;  %1168 = vmatprep.mubr.msk.bf16.mxu0 %vm1259_vm1, %v1258_v0 }
 0x3f0   : > { %v836_v40 = vsel %vm340_vm0, %v1217_v39, 0.0  ;;  %v841_v41 = vpack.c.bf16 %v1217_v39, %v1217_v39  ;;  %v1219_v42 = vpop.eup %1218 }
 0x3f1   : > { %837 = vadd.xlane.f32.xlu0 %v836_v40  ;;  %v1221_v44 = vpop.eup %1220  ;;  %v558_v48 = vmul.f32 %v1219_v42, %v542_v47 }
 0x3f2   : > { %v1223_v46 = vpop.eup %1222  ;;  %v698_v53 = vmul.f32 %v1221_v44, %v682_v19 }
 0x3f3   : > { %v1225_v0 = vpop.eup %1224  ;;  %v416_v16 = vmul.f32 %v1223_v46, %v400_v50 }
 0x3f4   : > { %v835_v59 = vmul.f32 %v1225_v0, %v819_v57 }
 0x3f6   : > { %1169 = vmatmul.mubr.msk.bf16.vlgmr.msra.gmra.mxu0 %vm340_vm0, %v841_v41  ;;  %620 = vperm.xlu1 %1207, %v1219_v42  }
 0x3fa   : > { %757 = vperm.xlu1 %1207, %v1221_v44  }
 0x407   : > { %474 = vperm.xlu0 %1206, %v1223_v46  }
 0x40b   : > { %894 = vperm.xlu0 %1206, %v1225_v0  }
 0x46a   : > { %v561_v49 = vpop.xlane.xlu1 %560 }
 0x46b   : > { %v562_v51 = vadd.f32 %v561_v49, %v558_v48 }
 0x46d   : > { %563 = vst.msk [vmem:[#allocation3 + $0x8] sm:$0xff] %vm331_vm2, %v562_v51 }
 0x46e   : > { %v419_v18 = vpop.xlane.xlu1 %418 }
 0x46f   : > { %v420_v52 = vadd.f32 %v419_v18, %v416_v16 }
 0x471   : > { %422 = vst.msk [vmem:[#allocation3] sm:$0xff] %vm331_vm2, %v420_v52 }
 0x472   : > { %v701_v54 = vpop.xlane.xlu0 %700  ;;  %v621_v10 = vpop.permute.xlu1 %620 }
 0x473   : > { %v702_v55 = vadd.f32 %v701_v54, %v698_v53  ;;  %v623_v11 = vmul.f32 %v621_v10, %v617_v9 }
 0x474   : > { %v913_v56 = vld [vmem:[#allocation3 + $0x8] sm:$0xff] }
 0x475   : > { %703 = vst.msk [vmem:[#allocation3 + $0x10] sm:$0xff] %vm331_vm2, %v702_v55  ;;  %1226 = vrcp.f32 %v913_v56 }
 0x476   : > { %v758_v17 = vpop.permute.xlu1 %757 }
 0x477   : > { %v760_v20 = vmul.f32 %v758_v17, %v754_v15 }
 0x478   : > { %v904_v58 = vld [vmem:[#allocation3] sm:$0xff] }
 0x479   : > { %1228 = vrcp.f32 %v904_v58 }
 0x47a   : > { %v838_v60 = vpop.xlane.xlu0 %837 }
 0x47b   : > { %v839_v61 = vadd.f32 %v838_v60, %v835_v59 }
 0x47c   : > { %v922_v62 = vld [vmem:[#allocation3 + $0x10] sm:$0xff] }
 0x47d   : > { %840 = vst.msk [vmem:[#allocation3 + $0x18] sm:$0xff] %vm331_vm2, %v839_v61  ;;  %1230 = vrcp.f32 %v922_v62 }
 0x482   : > { %v1227_v1 = vpop.eup %1226  ;;  %v475_v2 = vpop.permute.xlu0 %474 }
 0x483   : > { %v477_v3 = vmul.f32 %v475_v2, %v471_v63  ;;  %918 = vperm.xlu0 %1206, %v1227_v1  }
 0x484   : > { %v931_v4 = vld [vmem:[#allocation3 + $0x18] sm:$0xff] }
 0x485   : > { %v478_v6 = vadd.f32 %v477_v3, %v1405_v36  ;;  %1232 = vrcp.f32 %v931_v4 }
 0x486   : > { %v1229_v5 = vpop.eup %1228  ;;  %v895_v26 = vpop.permute.xlu0 %894 }
 0x487   : > { %479 = vst.msk [vmem:[#allocation4] sm:$0xff] %vm340_vm0, %v478_v6  ;;  %909 = vperm.xlu1 %1207, %v1229_v5   ;;  %v897_v30 = vmul.f32 %v895_v26, %v891_v25 }
 0x48a   : > { %v1231_v7 = vpop.eup %1230 }
 0x48b   : > { %927 = vperm.xlu1 %1207, %v1231_v7  }
 0x48e   : > { %v906_v46 = vld [vmem:[#allocation4] sm:$0xff] }
 0x492   : > { %v1233_v8 = vpop.eup %1232 }
 0x493   : > { %936 = vperm.xlu0 %1206, %v1233_v8  }
 0x4a6   : > { %v610_v12 = vpop.f32.mrf.mxu0 }
 0x4a7   : > { %v624_v13 = vadd.f32 %v623_v11, %v610_v12 }
 0x4a8   : > { %v1146_v14 = vpop.f32.mrf.mxu0 }
 0x4a9   : > { %625 = vst.msk [vmem:[#allocation4 + $0x8] sm:$0xff] %vm340_vm0, %v624_v13 }
 0x4aa   : > { %v613_v36 = vpop.f32.mrf.mxu0 }
 0x4ac   : > { %v1147_v21 = vpop.f32.mrf.mxu0 }
 0x4ae   : > { %v747_v22 = vpop.f32.mrf.mxu0 }
 0x4af   : > { %v761_v23 = vadd.f32 %v760_v20, %v747_v22 }
 0x4b0   : > { %v1158_v24 = vpop.f32.mrf.mxu0  ;;  %v915_v27 = vld [vmem:[#allocation4 + $0x8] sm:$0xff] }
 0x4b1   : > { %762 = vst.msk [vmem:[#allocation4 + $0x10] sm:$0xff] %vm340_vm0, %v761_v23 }
 0x4b2   : > { %v750_v28 = vpop.f32.mrf.mxu0 }
 0x4b4   : > { %v1159_v29 = vpop.f32.mrf.mxu0 }
 0x4b6   : > { %v884_v31 = vpop.f32.mrf.mxu0 }
 0x4b7   : > { %v898_v32 = vadd.f32 %v897_v30, %v884_v31 }
 0x4b8   : > { %v1170_v33 = vpop.f32.mrf.mxu0  ;;  %v924_v40 = vld [vmem:[#allocation4 + $0x10] sm:$0xff] }
 0x4b9   : > { %899 = vst.msk [vmem:[#allocation4 + $0x18] sm:$0xff] %vm340_vm0, %v898_v32 }
 0x4ba   : > { %v887_v34 = vpop.f32.mrf.mxu0 }
 0x4bc   : > { %v1171_v35 = vpop.f32.mrf.mxu0 }
 0x4c0   : > { %v933_v43 = vld [vmem:[#allocation4 + $0x18] sm:$0xff] }
 0x4fe   : > { %v919_v37 = vpop.permute.xlu0 %918 }
 0x4ff   : > { %v921_v38 = vmul.f32 %v919_v37, %v915_v27 }
 0x501   : > { %941 = vrot.lane.b32.xlu1 %v921_v38, %s1265_s10 }
 0x502   : > { %v910_v39 = vpop.permute.xlu1 %909 }
 0x503   : > { %v912_v47 = vmul.f32 %v910_v39, %v906_v46 }
 0x506   : > { %v928_v41 = vpop.permute.xlu1 %927 }
 0x507   : > { %v930_v42 = vmul.f32 %v928_v41, %v924_v40 }
 0x509   : > { %945 = vrot.lane.b32.xlu0 %v930_v42, %s1266_s11 }
 0x50e   : > { %v937_v44 = vpop.permute.xlu0 %936 }
 0x50f   : > { %v939_v45 = vmul.f32 %v937_v44, %v933_v43 }
 0x511   : > { %949 = vrot.lane.b32.xlu1 %v939_v45, %s1267_s12 }
 0x573   : > { %v942_v0 = vpop.permute.xlu1 %941 }
 0x574   : > { %v952_v49 = vsel %vm340_vm0, %v912_v47, %v942_v0 }
 0x57b   : > { %v946_v48 = vpop.permute.xlu0 %945 }
 0x57c   : > { %v954_v50 = vsel %vm953_vm5, %v952_v49, %v946_v48 }
 0x583   : > { %v950_v51 = vpop.permute.xlu1 %949 }
 0x584   : > { %v956_v16 = vsel %vm955_vm6, %v954_v50, %v950_v51 }
 0x585   : > { %v957_v18 = vpack.c.bf16 %v956_v16, %v956_v16 }
 0x587   : > { %959 = vst.msk [vmem:[%s325_s15] sm:$0xf] %vm958_vm7, %v957_v18 }
 0x588 PF: > { %s14_s17 = sadd.s32 1, %s1256_s17   ;;  %s1472_s15 = smov %s1252_s16 }
 0x589   : > { %p11_p5 = scmp.ge.s32.totalorder %s14_s17, 4   ;;  %s1473_s16 = smov %s1475_s18 }
 0x58b   :  { %13 = sbr.rel (!%p11_p5) target bundleno = 2 (0x2), region = 92 }

// kernel: decoder_block.15
= control target key start
LH: loop header
LB: loop body
LE: loop exit
PB: predicated region body
PF: predicated region fallthrough
CT: control target
= control target key end

     0   :  { %12 = vsyncpa [#allocation5], 0  ;;  %s486_s0 = inlined_call_operand.vmem [shape: f32[2], index: 0, kind: input, shape index: {}]   ;;  %s487_s1 = inlined_call_operand.vmem [shape: f32[16,32], index: 1, kind: input, shape index: {}, may-alias: {1,6}]   ;;  %s488_s2 = inlined_call_operand.vmem [shape: bf16[32,64], index: 2, kind: input, shape index: {}]   ;;  %s489_s3 = inlined_call_operand.vmem [shape: f32[1,64], index: 3, kind: input, shape index: {}]   ;;  %s490_s4 = inlined_call_operand.vmem [shape: bf16[64,32], index: 4, kind: input, shape index: {}]   ;;  %s491_s5 = inlined_call_operand.vmem [shape: f32[1,32], index: 5, kind: input, shape index: {}]   ;;  %s492_s6 = inlined_call_operand.vmem [shape: f32[16,32], index: 6, kind: input, shape index: {}, may-alias: {1,6}]   ;;  %s493_s7 = inlined_call_operand.hbm [shape: f32[16,32], index: 7, kind: output, shape index: {}]  }
   0x1   :  { %13 = vsyncpa [#allocation4], 0  ;;  %s20_s26 = sshll.u32 %s486_s0, 4  ;;  %s21_s26 = int_to_ptr.vmem [resolvable:$true] %s20_s26 }
   0x2   :  { %s351_s27 = scalar_lea.vmem %s21_s26, 16  ;;  %p356_p1 = scmp.lt.s32.totalorder %s21_s26, %s21_s26 }
   0x3   :  { %p352_p0 = scmp.ne.s32.totalorder %s21_s26, %s351_s27  ;;  %p357_p2 = scmp.lt.s32.totalorder %s351_s27, %s351_s27 }
   0x5   :  { %p358_p3 = por %p357_p2, %p356_p1 }
   0x7   :  { %p359_p4 = pnand %p358_p3, %p352_p0 }
   0x9   :  { %362 = shalt.err (!%p359_p4)
}
   0xa   :  { %s387_s28 = smov [#allocation3]  }
   0xb   :  { %23 = dma.vmem_to_smem %s21_s26, 16, %s387_s28, [#allocation5]  }
   0xc   :  { %383 = dma.done.wait [#allocation5], 16  }
   0xd   :  { %384 = vsyncadd [#allocation5], 4294967280 }
   0xe   :  { %39 = sfence }
   0xf   :  { %vm45_vm0 = vcmask 261120   ;;  %v48_v0 = vld [vmem:[%s487_s1] sm:$0xff]  ;;  %v49_v1 = vld [vmem:[%s487_s1 + $0x8] sm:$0xff]  ;;  %v388_v15 = vmov 0.0   ;;  %vm389_vm1 = vmmov 0   ;;  %v339_v17 = vld [vmem:[%s490_s4 + $0x18] sm:$0xff]  }
  0x10   :  { %v51_v2 = vsel %vm45_vm0, %v48_v0, 0.0  ;;  %v54_v3 = vsel %vm45_vm0, %v49_v1, 0.0  ;;  %v337_v14 = vld [vmem:[%s488_s2 + $0x8] sm:$0xff]   ;;  %311 = vmatprep.subr.bf16.mxu0 %v388_v15  ;;  %46 = vst.msk [vmem:[#allocation2] sm:$0xff] %vm45_vm0, %v388_v15  ;;  %47 = vst.msk [vmem:[#allocation2 + $0x8] sm:$0xff] %vm45_vm0, %v388_v15  ;;  %315 = vmatprep.mubr.msk.bf16.mxu0 %vm389_vm1, %v388_v15  ;;  %v338_v16 = vld [vmem:[%s488_s2] sm:$0xff]  }
  0x11   :  { %52 = vadd.xlane.f32.xlu0 %v51_v2  ;;  %312 = vmatpush3.bf16.msra.mxu0 %v337_v14  ;;  %s73_s2 = sld [smem:[#allocation3]]  ;;  %v340_v45 = vld [vmem:[%s490_s4 + $0x10] sm:$0xff]   ;;  %v341_v46 = vld [vmem:[%s490_s4 + $0x8] sm:$0xff]   ;;  %v342_v47 = vld [vmem:[%s490_s4] sm:$0xff]   ;;  %vm206_vm6 = vcmask 523264   ;;  %s390_s25 = smov [#allocation6]  }
  0x12   :  { %319 = vmatprep.subr.bf16.mxu1 %v388_v15  ;;  %313 = vmatprep.subr.bf16.mxu0 %v388_v15  ;;  %s292_s14 = sld [smem:[#allocation3 + $0x1]]  ;;  %v293_v48 = vld [vmem:[%s489_s3] ss:$0 sm:$0xff]  ;;  %s280_s26 = sshll.u32 %s390_s25, 4  ;;  %s281_s26 = int_to_ptr.vmem [resolvable:$true] %s280_s26 }
  0x13   :  { %327 = vmatprep.mubr.msk.bf16.mxu1 %vm389_vm1, %v388_v15  ;;  %320 = vmatpush3.bf16.msra.mxu1 %v339_v17  ;;  %v302_v2 = vld [vmem:[%s491_s5] ss:$0 sm:$0xff]  ;;  %s363_s5 = scalar_lea.vmem %s281_s26, 256  ;;  %p368_p6 = scmp.lt.s32.totalorder %s281_s26, %s281_s26 }
  0x14   :  { %321 = vmatprep.subr.bf16.mxu1 %v388_v15  ;;  %p364_p5 = scmp.ne.s32.totalorder %s281_s26, %s363_s5  ;;  %p369_p7 = scmp.lt.s32.totalorder %s363_s5, %s363_s5 }
  0x15   :  { %55 = vadd.xlane.f32.xlu0 %v54_v3  ;;  %314 = vmatpush3.bf16.msra.mxu0 %v338_v16 }
  0x16   :  { %p370_p8 = por %p369_p7, %p368_p6 }
  0x17   :  { %v74_v34 = vstv %s73_s2  ;;  %322 = vmatpush3.bf16.msra.mxu1 %v340_v45  ;;  %v172_v58 = vld [vmem:[#allocation2] sm:$0xff]  ;;  %v173_v62 = vld [vmem:[#allocation2 + $0x8] sm:$0xff] }
  0x18   :  { %v98_v40 = vstv %s292_s14  ;;  %323 = vmatprep.subr.bf16.mxu1 %v388_v15  ;;  %p371_p9 = pnand %p370_p8, %p364_p5 }
  0x1b   :  { %324 = vmatpush3.bf16.msra.mxu1 %v341_v46 }
  0x1c   :  { %325 = vmatprep.subr.bf16.mxu1 %v388_v15 }
  0x1f   :  { %326 = vmatpush3.bf16.msra.mxu1 %v342_v47 }
  0x9a   :  { %v53_v4 = vpop.xlane.xlu0 %52 }
  0x9b   :  { %v58_v5 = vmul.f32 0.03125, %v53_v4  ;;  %v269_v4 = vld [vmem:[%s492_s6] sm:$0xff] }
  0x9d   :  { %v60_v6 = vsub.f32 %v48_v0, %v58_v5 }
  0x9e   :  { %v56_v7 = vpop.xlane.xlu0 %55 }
  0x9f   :  { %v59_v8 = vmul.f32 0.03125, %v56_v7  ;;  %v62_v9 = vmul.f32 %v60_v6, %v60_v6  ;;  %v75_v36 = vmul.f32 %v74_v34, %v60_v6 }
  0xa1   :  { %v61_v10 = vsub.f32 %v49_v1, %v59_v8  ;;  %v64_v11 = vsel %vm45_vm0, %v62_v9, 0.0  ;;  %v270_v8 = vld [vmem:[%s492_s6 + $0x8] sm:$0xff] }
  0xa2   :  { %65 = vadd.xlane.f32.xlu1 %v64_v11 }
  0xa3   :  { %v63_v12 = vmul.f32 %v61_v10, %v61_v10  ;;  %v76_v37 = vmul.f32 %v74_v34, %v61_v10 }
  0xa5   :  { %v67_v13 = vsel %vm45_vm0, %v63_v12, 0.0 }
  0xa6   :  { %68 = vadd.xlane.f32.xlu1 %v67_v13 }
 0x12b   :  { %v66_v18 = vpop.xlane.xlu1 %65 }
 0x12c   :  { %v71_v19 = vmul.f32 0.032258064, %v66_v18 }
 0x12e   :  { %343 = vrsqrt.f32 %v71_v19  ;;  %vm79_vm2 = vcmp.eq.f32.partialorder %v71_v19, inf  ;;  %v82_v24 = vand.u32 2147483648, %v71_v19  ;;  %vm81_vm3 = vcmp.eq.f32.partialorder %v71_v19, 0.0 }
 0x12f   :  { %v69_v20 = vpop.xlane.xlu1 %68 }
 0x130   :  { %v72_v21 = vmul.f32 0.032258064, %v69_v20 }
 0x132   :  { %345 = vrsqrt.f32 %v72_v21  ;;  %vm86_vm4 = vcmp.eq.f32.partialorder %v72_v21, inf  ;;  %v89_v30 = vand.u32 2147483648, %v72_v21  ;;  %vm88_vm5 = vcmp.eq.f32.partialorder %v72_v21, 0.0 }
 0x13b   :  { %v344_v22 = vpop.eup %343 }
 0x13c   :  { %v78_v23 = vmul.f32 %v344_v22, %v71_v19 }
 0x13e   :  { %v80_v25 = vsel %vm79_vm2, %v71_v19, %v78_v23 }
 0x13f   :  { %v346_v26 = vpop.eup %345  ;;  %v83_v27 = vsel %vm81_vm3, %v82_v24, %v80_v25 }
 0x140   :  { %v91_v28 = vadd.f32 1e-06, %v83_v27  ;;  %v85_v29 = vmul.f32 %v346_v26, %v72_v21 }
 0x142   :  { %347 = vrcp.f32 %v91_v28  ;;  %v87_v31 = vsel %vm86_vm4, %v72_v21, %v85_v29 }
 0x143   :  { %v90_v32 = vsel %vm88_vm5, %v89_v30, %v87_v31 }
 0x144   :  { %v92_v33 = vadd.f32 1e-06, %v90_v32 }
 0x146   :  { %349 = vrcp.f32 %v92_v33 }
 0x14f   :  { %v348_v35 = vpop.eup %347 }
 0x150   :  { %v94_v38 = vmul.f32 %v348_v35, %v75_v36 }
 0x152   :  { %v99_v42 = vadd.f32 %v98_v40, %v94_v38 }
 0x153   :  { %v350_v39 = vpop.eup %349 }
 0x154   :  { %v96_v41 = vmul.f32 %v350_v39, %v76_v37 }
 0x156   :  { %v100_v43 = vadd.f32 %v98_v40, %v96_v41 }
 0x158   :  { %v101_v44 = vpack.c.bf16 %v100_v43, %v99_v42 }
 0x15a   :  { %316 = vmatmul.mubr.msk.bf16.vlgmr.msra.gmra.mxu0 %vm45_vm0, %v101_v44 }
 0x21a   :  { %v162_v49 = vpop.f32.mrf.mxu0 }
 0x21b   :  { %v163_v51 = vadd.f32 %v293_v48, %v162_v49 }
 0x21c   :  { %v317_v50 = vpop.f32.mrf.mxu0 }
 0x21d   :  { %v169_v55 = vmax.f32 %v163_v51, 0.0 }
 0x21e   :  { %v165_v52 = vpop.f32.mrf.mxu0 }
 0x21f   :  { %v166_v53 = vadd.f32 %v293_v48, %v165_v52 }
 0x220   :  { %v318_v54 = vpop.f32.mrf.mxu0 }
 0x221   :  { %v170_v56 = vmax.f32 %v166_v53, 0.0 }
 0x223   :  { %v171_v57 = vpack.c.bf16 %v170_v56, %v169_v55 }
 0x225   :  { %328 = vmatmul.mubr.msk.bf16.vlgmr.msra.gmra.mxu1 %vm206_vm6, %v171_v57 }
 0x2e5   :  { %v244_v59 = vpop.f32.mrf.mxu1 }
 0x2e6   :  { %v251_v60 = vadd.f32 %v244_v59, %v172_v58 }
 0x2e7   :  { %v329_v61 = vpop.f32.mrf.mxu1 }
 0x2e8   :  { %253 = vst.msk [vmem:[#allocation2] sm:$0xff] %vm45_vm0, %v251_v60 }
 0x2e9   :  { %v247_v63 = vpop.f32.mrf.mxu1 }
 0x2ea   :  { %v252_v0 = vadd.f32 %v247_v63, %v173_v62 }
 0x2eb   :  { %v330_v1 = vpop.f32.mrf.mxu1 }
 0x2ec   :  { %254 = vst.msk [vmem:[#allocation2 + $0x8] sm:$0xff] %vm45_vm0, %v252_v0 }
 0x2ef   :  { %v258_v3 = vld [vmem:[#allocation2] sm:$0xff] }
 0x2f0   :  { %v267_v5 = vadd.f32 %v302_v2, %v258_v3 }
 0x2f2   :  { %v271_v6 = vadd.f32 %v269_v4, %v267_v5 }
 0x2f3   :  { %v259_v7 = vld [vmem:[#allocation2 + $0x8] sm:$0xff] }
 0x2f4   :  { %v268_v9 = vadd.f32 %v302_v2, %v259_v7  ;;  %273 = vst.msk [vmem:[#allocation6] sm:$0xff] %vm45_vm0, %v271_v6 }
 0x2f6   :  { %v272_v10 = vadd.f32 %v270_v8, %v268_v9 }
 0x2f8   :  { %274 = vst.msk [vmem:[#allocation6 + $0x8] sm:$0xff] %vm45_vm0, %v272_v10 }
 0x2f9   :  { %374 = shalt.err (!%p371_p9)
}
 0x2fa   :  { %s391_s29 = smov 128   ;;  %s392_s30 = smov 8  }
 0x2fb   :  { %286 = dma.vmem_to_hbm [thread:$0]  %s281_s26, 256, %s493_s7, [#allocation4], %s391_s29, %s391_s29, %s392_s30  }
 0x2fc   :  { %385 = dma.done.wait [#allocation4], 256  }
 0x2fd   :  { %386 = vsyncadd [#allocation4], 4294967040 }
 0x2fe   :  { %290 = vsyncpa [#allocation4], 1 }
 0x2ff   :  { %291 = vsyncpa [#allocation5], 1 }

// kernel: decoder_block.11
= control target key start
LH: loop header
LB: loop body
LE: loop exit
PB: predicated region body
PF: predicated region fallthrough
CT: control target
= control target key end

     0   :  { %9 = vsyncpa [#allocation3], 0  ;;  %s272_s0 = inlined_call_operand.vmem [shape: f32[2], index: 0, kind: input, shape index: {}]   ;;  %s273_s1 = inlined_call_operand.vmem [shape: f32[16,32], index: 1, kind: input, shape index: {}]   ;;  %s274_s2 = inlined_call_operand.vmem [shape: bf16[32,32], index: 2, kind: input, shape index: {}]   ;;  %s275_s3 = inlined_call_operand.vmem [shape: f32[1,32], index: 3, kind: input, shape index: {}]   ;;  %s276_s4 = inlined_call_operand.vmem [shape: bf16[16,32], index: 4, kind: output, shape index: {}]  }
   0x1   :  { %s16_s17 = sshll.u32 %s272_s0, 4  ;;  %s17_s17 = int_to_ptr.vmem [resolvable:$true] %s16_s17 }
   0x2   :  { %s201_s18 = scalar_lea.vmem %s17_s17, 16  ;;  %p206_p1 = scmp.lt.s32.totalorder %s17_s17, %s17_s17 }
   0x3   :  { %p202_p0 = scmp.ne.s32.totalorder %s17_s17, %s201_s18  ;;  %p207_p2 = scmp.lt.s32.totalorder %s201_s18, %s201_s18 }
   0x5   :  { %p208_p3 = por %p207_p2, %p206_p1 }
   0x7   :  { %p209_p4 = pnand %p208_p3, %p202_p0 }
   0x9   :  { %212 = shalt.err (!%p209_p4)
}
   0xa   :  { %s215_s19 = smov [#allocation2]  }
   0xb   :  { %19 = dma.vmem_to_smem %s17_s17, 16, %s215_s19, [#allocation3]  }
   0xc   :  { %213 = dma.done.wait [#allocation3], 16  }
   0xd   :  { %214 = vsyncadd [#allocation3], 4294967280 }
   0xe   :  { %29 = sfence }
   0xf   :  { %v31_v0 = vld [vmem:[%s273_s1] sm:$0xff]  ;;  %vm33_vm0 = vcmask 261120   ;;  %v32_v1 = vld [vmem:[%s273_s1 + $0x8] sm:$0xff]  ;;  %v216_v15 = vmov 0.0   ;;  %vm217_vm1 = vmmov 0   ;;  %s168_s26 = sld [smem:[#allocation2 + $0x1]] }
  0x10   :  { %v34_v2 = vsel %vm33_vm0, %v31_v0, 0.0  ;;  %v37_v3 = vsel %vm33_vm0, %v32_v1, 0.0  ;;  %v191_v14 = vld [vmem:[%s274_s2 + $0x8] sm:$0xff]   ;;  %180 = vmatprep.subr.bf16.mxu0 %v216_v15  ;;  %184 = vmatprep.mubr.msk.bf16.mxu0 %vm217_vm1, %v216_v15  ;;  %v192_v16 = vld [vmem:[%s274_s2] sm:$0xff]   ;;  %s56_s2 = sld [smem:[#allocation2]]  ;;  %vm160_vm6 = vcmask 257024  }
  0x11   :  { %35 = vadd.xlane.f32.xlu0 %v34_v2  ;;  %181 = vmatpush3.bf16.msra.mxu0 %v191_v14  ;;  %v169_v44 = vld [vmem:[%s275_s3] ss:$0 sm:$0xff] }
  0x12   :  { %182 = vmatprep.subr.bf16.mxu0 %v216_v15 }
  0x15   :  { %38 = vadd.xlane.f32.xlu0 %v37_v3  ;;  %183 = vmatpush3.bf16.msra.mxu0 %v192_v16  ;;  %v81_v39 = vstv %s168_s26 }
  0x16   :  { %v57_v33 = vstv %s56_s2 }
  0x9a   :  { %v36_v4 = vpop.xlane.xlu0 %35 }
  0x9b   :  { %v41_v5 = vmul.f32 0.03125, %v36_v4 }
  0x9d   :  { %v43_v6 = vsub.f32 %v31_v0, %v41_v5 }
  0x9e   :  { %v39_v7 = vpop.xlane.xlu0 %38 }
  0x9f   :  { %v42_v8 = vmul.f32 0.03125, %v39_v7  ;;  %v45_v9 = vmul.f32 %v43_v6, %v43_v6  ;;  %v58_v35 = vmul.f32 %v57_v33, %v43_v6 }
  0xa1   :  { %v44_v10 = vsub.f32 %v32_v1, %v42_v8  ;;  %v47_v11 = vsel %vm33_vm0, %v45_v9, 0.0 }
  0xa2   :  { %48 = vadd.xlane.f32.xlu1 %v47_v11 }
  0xa3   :  { %v46_v12 = vmul.f32 %v44_v10, %v44_v10  ;;  %v59_v36 = vmul.f32 %v57_v33, %v44_v10 }
  0xa5   :  { %v50_v13 = vsel %vm33_vm0, %v46_v12, 0.0 }
  0xa6   :  { %51 = vadd.xlane.f32.xlu1 %v50_v13 }
 0x12b   :  { %v49_v17 = vpop.xlane.xlu1 %48 }
 0x12c   :  { %v54_v18 = vmul.f32 0.032258064, %v49_v17 }
 0x12e   :  { %193 = vrsqrt.f32 %v54_v18  ;;  %vm62_vm2 = vcmp.eq.f32.partialorder %v54_v18, inf  ;;  %v65_v23 = vand.u32 2147483648, %v54_v18  ;;  %vm64_vm3 = vcmp.eq.f32.partialorder %v54_v18, 0.0 }
 0x12f   :  { %v52_v19 = vpop.xlane.xlu1 %51 }
 0x130   :  { %v55_v20 = vmul.f32 0.032258064, %v52_v19 }
 0x132   :  { %195 = vrsqrt.f32 %v55_v20  ;;  %vm69_vm4 = vcmp.eq.f32.partialorder %v55_v20, inf  ;;  %v72_v29 = vand.u32 2147483648, %v55_v20  ;;  %vm71_vm5 = vcmp.eq.f32.partialorder %v55_v20, 0.0 }
 0x13b   :  { %v194_v21 = vpop.eup %193 }
 0x13c   :  { %v61_v22 = vmul.f32 %v194_v21, %v54_v18 }
 0x13e   :  { %v63_v24 = vsel %vm62_vm2, %v54_v18, %v61_v22 }
 0x13f   :  { %v196_v25 = vpop.eup %195  ;;  %v66_v26 = vsel %vm64_vm3, %v65_v23, %v63_v24 }
 0x140   :  { %v74_v27 = vadd.f32 1e-06, %v66_v26  ;;  %v68_v28 = vmul.f32 %v196_v25, %v55_v20 }
 0x142   :  { %197 = vrcp.f32 %v74_v27  ;;  %v70_v30 = vsel %vm69_vm4, %v55_v20, %v68_v28 }
 0x143   :  { %v73_v31 = vsel %vm71_vm5, %v72_v29, %v70_v30 }
 0x144   :  { %v75_v32 = vadd.f32 1e-06, %v73_v31 }
 0x146   :  { %199 = vrcp.f32 %v75_v32 }
 0x14f   :  { %v198_v34 = vpop.eup %197 }
 0x150   :  { %v77_v37 = vmul.f32 %v198_v34, %v58_v35 }
 0x152   :  { %v82_v41 = vadd.f32 %v81_v39, %v77_v37 }
 0x153   :  { %v200_v38 = vpop.eup %199 }
 0x154   :  { %v79_v40 = vmul.f32 %v200_v38, %v59_v36 }
 0x156   :  { %v83_v42 = vadd.f32 %v81_v39, %v79_v40 }
 0x158   :  { %v84_v43 = vpack.c.bf16 %v83_v42, %v82_v41 }
 0x15a   :  { %185 = vmatmul.mubr.msk.bf16.vlgmr.msra.gmra.mxu0 %vm33_vm0, %v84_v43 }
 0x21a   :  { %v145_v45 = vpop.f32.mrf.mxu0 }
 0x21b   :  { %v146_v46 = vadd.f32 %v169_v44, %v145_v45 }
 0x21c   :  { %v186_v47 = vpop.f32.mrf.mxu0 }
 0x21d   :  { %v175_v48 = vpack.c.bf16 %v146_v46, %v146_v46 }
 0x21e   :  { %v148_v49 = vpop.f32.mrf.mxu0 }
 0x21f   :  { %161 = vst.msk [vmem:[%s276_s4] sm:$0xf] %vm160_vm6, %v175_v48  ;;  %v149_v50 = vadd.f32 %v169_v44, %v148_v49 }
 0x220   :  { %v187_v51 = vpop.f32.mrf.mxu0 }
 0x221   :  { %v176_v52 = vpack.c.bf16 %v149_v50, %v149_v50 }
 0x223   :  { %162 = vst.msk [vmem:[%s276_s4 + $0x4] sm:$0xf] %vm160_vm6, %v176_v52 }
 0x224   :  { %167 = vsyncpa [#allocation3], 1 }

</bundles_post_ra>
